<compile_context>
chip_gen: v5e
topology: v5e:2x2
jax: 0.10.0
libtpu: 0.0.40
codegen_flags: <defaults>
</compile_context>

<pallas_src>
import functools

import jax
import jax.numpy as jnp
from jax import lax
from jax.experimental import pallas as pl
from jax.experimental.pallas import tpu as pltpu

_SUB = 8                    # sublanes per vreg
_LANE = 128                 # lanes per vreg
_VREG_BATCH = _SUB * _LANE  # 1024 homographies per vreg chunk
_VPB_MAX = 8                # vreg chunks per grid step (amortizes ~0.35us/step)
_SQUARINGS = 5              # scaling-and-squaring steps
_ORDER = 6                  # Horner-Taylor order

# Static nonzero pattern (k, i, j) of the sl(3) generator basis from __init__.
# TODO(synk): the zero-structure of `elements` is baked here; the nonzero
# values themselves are still read from the runtime buffer.
_TERMS = (
    (0, 0, 2), (1, 1, 2),
    (2, 0, 1), (2, 1, 0),
    (3, 0, 0), (3, 1, 1), (3, 2, 2),
    (4, 0, 0), (4, 1, 1),
    (5, 0, 1), (5, 1, 0),
    (6, 2, 0), (7, 2, 1),
)


def _matmul3(X, Y):
    # Batched 3x3 matmul on (8,128) tiles, fully unrolled on the VPU
    # (27 vmul + 18 vadd).  A 3x3 problem would waste the MXU.
    return [[sum(X[i][j] * Y[j][k] for j in range(3)) for k in range(3)]
            for i in range(3)]


def _plus_identity(M, inv_n):
    # M * inv_n + I without identity vregs: diagonal gets a scalar-constant add,
    # off-diagonals get nothing.  inv_n == 1.0 (last Horner step) skips the mul.
    if inv_n == 1.0:
        out = [[M[i][j] for j in range(3)] for i in range(3)]
    else:
        out = [[M[i][j] * inv_n for j in range(3)] for i in range(3)]
    for d in range(3):
        out[d][d] = out[d][d] + 1.0
    return out


def _lie_homography_kernel(coef_ref, lie_ref, o_ref, *,
                           squarings, order, vregs_per_block):
    # coef_ref: (13,) f32 SMEM  -- elements[k,i,j] * weights[k] * 2^-squarings
    # lie_ref : (vpb, 8, 8, 128) f32 VMEM -- [chunk, generator k, sublane, lane]
    # o_ref   : (vpb, 9, 8, 128) f32 VMEM -- [chunk, entry i*3+j, sublane, lane]
    def one_chunk(v, carry):
        lie = lie_ref[v]                                   # (8, 8, 128)

        # A (pre-scaled by 2^-squarings) from the 13 nonzero generator entries.
        A = [[None] * 3 for _ in range(3)]
        for t, (k, i, j) in enumerate(_TERMS):
            term = coef_ref[t] * lie[k]
            A[i][j] = term if A[i][j] is None else A[i][j] + term

        # exp(A) via Horner-form Taylor: I + A(I + A/2(...(I + A/N))).
        T = _plus_identity(A, 1.0 / order)
        for n in range(order - 1, 0, -1):
            T = _plus_identity(_matmul3(A, T), 1.0 / n)

        # Undo the scaling by repeated squaring.
        for _ in range(squarings):
            T = _matmul3(T, T)

        # Projective normalization: EUP reciprocal + one Newton step.
        inv = pl.reciprocal(T[2][2], approx=True)
        inv = inv * (2.0 - T[2][2] * inv)

        for i in range(3):
            for j in range(3):
                o_ref[v, i * 3 + j] = T[i][j] * inv        # full-tile store
        return carry

    lax.fori_loop(0, vregs_per_block, one_chunk, 0)


@functools.partial(jax.jit, static_argnames=("squarings", "order"))
def lie_homographies_forward(lie_vectors, weights, elements,
                             *, squarings=_SQUARINGS, order=_ORDER):
    """lie_vectors: (B, 8, 1, 1); weights: (1, 8, 1, 1); elements: (8, 3, 3)."""
    B = lie_vectors.shape[0]
    lie = jnp.squeeze(lie_vectors, axis=(2, 3)).astype(jnp.float32)      # (B, 8)

    num_chunks = -(-B // _VREG_BATCH)
    vpb = min(_VPB_MAX, num_chunks)
    grid_len = -(-num_chunks // vpb)
    padded_chunks = grid_len * vpb
    Bp = padded_chunks * _VREG_BATCH

    # Padded rows are zero -> exp(0) = I, divide by 1: no NaNs.
    lie_pad = jnp.pad(lie, ((0, Bp - B), (0, 0)))                        # (Bp, 8)
    # [chunk, generator, sublane, lane]; batch b = chunk*1024 + sub*128 + lane
    lie_t = lie_pad.reshape(padded_chunks, _SUB, _LANE, 8).transpose(0, 3, 1, 2)

    # Per-term scalar coefficients (2^-squarings folded in here, not in-kernel).
    w = jnp.squeeze(weights, axis=(0, 2, 3)).astype(jnp.float32)         # (8,)
    e = elements.astype(jnp.float32)                                     # (8,3,3)
    ks = jnp.array([t[0] for t in _TERMS], jnp.int32)
    iis = jnp.array([t[1] for t in _TERMS], jnp.int32)
    jjs = jnp.array([t[2] for t in _TERMS], jnp.int32)
    coef = e[ks, iis, jjs] * w[ks] * (2.0 ** (-squarings))               # (13,)

    kernel = functools.partial(_lie_homography_kernel, squarings=squarings,
                               order=order, vregs_per_block=vpb)

    out = pl.pallas_call(
        kernel,
        grid=(grid_len,),
        in_specs=[
            pl.BlockSpec(memory_space=pltpu.MemorySpace.SMEM),           # coef
            pl.BlockSpec((vpb, 8, _SUB, _LANE), lambda g: (g, 0, 0, 0)), # lie
        ],
        out_specs=pl.BlockSpec((vpb, 9, _SUB, _LANE), lambda g: (g, 0, 0, 0)),
        out_shape=jax.ShapeDtypeStruct((padded_chunks, 9, _SUB, _LANE),
                                       jnp.float32),
        compiler_params=pltpu.CompilerParams(
            dimension_semantics=("parallel",)),
    )(coef, lie_t)

    # (chunks, 9, 8, 128) -> (Bp, 9) -> (B, 3, 3); dtype_out = float32
    H = out.transpose(0, 2, 3, 1).reshape(Bp, 9)[:B].reshape(B, 3, 3)
    return H.astype(jnp.float32)


def _reference(lie_vectors, weights, elements):
    # Plain-JAX reference mirroring the PyTorch forward (f32 instead of f64).
    A = (lie_vectors.astype(jnp.float32)
         * elements.astype(jnp.float32)[None]
         * weights.astype(jnp.float32)).sum(axis=1)                      # (B,3,3)
    H = jax.vmap(jax.scipy.linalg.expm)(A)
    return (H / H[:, 2:3, 2:3]).astype(jnp.float32)


if __name__ == "__main__":
    B = 4  # n_homographies

    # Module inits lie_vectors to zeros; use small random values so the
    # matrix-exponential path is actually exercised.
    key = jax.random.PRNGKey(0)
    lie_vectors = (0.1 * jax.random.normal(key, (B, 8, 1, 1))).astype(jnp.float32)

    # Buffers exactly as in __init__ (all per-generator weights = 1.0).
    weights = jnp.ones((1, 8, 1, 1), jnp.float32)
    elements = jnp.zeros((8, 3, 3), jnp.float32)
    elements = elements.at[0, 0, 2].set(1.0)
    elements = elements.at[1, 1, 2].set(1.0)
    elements = elements.at[2, 0, 1].set(-1.0)
    elements = elements.at[2, 1, 0].set(1.0)
    elements = elements.at[3, 0, 0].set(1.0)
    elements = elements.at[3, 1, 1].set(1.0)
    elements = elements.at[3, 2, 2].set(-2.0)
    elements = elements.at[4, 0, 0].set(1.0)
    elements = elements.at[4, 1, 1].set(-1.0)
    elements = elements.at[5, 0, 1].set(1.0)
    elements = elements.at[5, 1, 0].set(1.0)
    elements = elements.at[6, 2, 0].set(1.0)
    elements = elements.at[7, 2, 1].set(1.0)

    H = lie_homographies_forward(lie_vectors, weights, elements)
    H = jax.block_until_ready(H)
    assert H.shape == (B, 3, 3) and H.dtype == jnp.float32

    H_ref = jax.block_until_ready(_reference(lie_vectors, weights, elements))
    assert bool(jnp.allclose(H, H_ref, atol=1e-3, rtol=1e-3)), (H, H_ref)

    print("KERNEL_OK")
</pallas_src>

<mosaic_0001>
module attributes {stable_mosaic.version = 11 : i64} {
  func.func @_lie_homography_kernel(%arg0: i32, %arg1: memref<13xf32, #tpu.memory_space<smem>>, %arg2: memref<1x8x8x128xf32, #tpu.memory_space<vmem>>, %arg3: memref<1x9x8x128xf32, #tpu.memory_space<vmem>>) attributes {dimension_semantics = [#tpu.dimension_semantics<parallel>], iteration_bounds = array<i64: 1>, scalar_prefetch = 0 : i64, scratch_operands = 0 : i64, tpu.core_type = #tpu.core_type<tc>, window_params = [{transform_indices = @transform_0, window_bounds = array<i64: 13>}, {transform_indices = @transform_1, window_bounds = array<i64: 1, 8, 8, 128>}, {transform_indices = @transform_2, window_bounds = array<i64: 1, 9, 8, 128>}]} {
    %c0_i32 = arith.constant 0 : i32
    %0 = arith.index_cast %c0_i32 : i32 to index
    %c0 = arith.constant 0 : index
    %c0_0 = arith.constant 0 : index
    %c0_1 = arith.constant 0 : index
    %1 = vector.load %arg2[%0, %c0, %c0_0, %c0_1] : memref<1x8x8x128xf32, #tpu.memory_space<vmem>>, vector<1x8x8x128xf32>
    %2 = vector.shape_cast %1 : vector<1x8x8x128xf32> to vector<8x8x128xf32>
    %c0_2 = arith.constant 0 : index
    %3 = memref.load %arg1[%c0_2] : memref<13xf32, #tpu.memory_space<smem>>
    %4 = vector.extract_strided_slice %2 {offsets = [0, 0, 0], sizes = [1, 8, 128], strides = [1, 1, 1]} : vector<8x8x128xf32> to vector<1x8x128xf32>
    %5 = vector.shape_cast %4 : vector<1x8x128xf32> to vector<8x128xf32>
    %6 = vector.broadcast %3 : f32 to vector<8x128xf32>
    %7 = arith.mulf %6, %5 : vector<8x128xf32>
    %c1 = arith.constant 1 : index
    %8 = memref.load %arg1[%c1] : memref<13xf32, #tpu.memory_space<smem>>
    %9 = vector.extract_strided_slice %2 {offsets = [1, 0, 0], sizes = [1, 8, 128], strides = [1, 1, 1]} : vector<8x8x128xf32> to vector<1x8x128xf32>
    %10 = vector.shape_cast %9 : vector<1x8x128xf32> to vector<8x128xf32>
    %11 = vector.broadcast %8 : f32 to vector<8x128xf32>
    %12 = arith.mulf %11, %10 : vector<8x128xf32>
    %c2 = arith.constant 2 : index
    %13 = memref.load %arg1[%c2] : memref<13xf32, #tpu.memory_space<smem>>
    %14 = vector.extract_strided_slice %2 {offsets = [2, 0, 0], sizes = [1, 8, 128], strides = [1, 1, 1]} : vector<8x8x128xf32> to vector<1x8x128xf32>
    %15 = vector.shape_cast %14 : vector<1x8x128xf32> to vector<8x128xf32>
    %16 = vector.broadcast %13 : f32 to vector<8x128xf32>
    %17 = arith.mulf %16, %15 : vector<8x128xf32>
    %c3 = arith.constant 3 : index
    %18 = memref.load %arg1[%c3] : memref<13xf32, #tpu.memory_space<smem>>
    %19 = vector.extract_strided_slice %2 {offsets = [2, 0, 0], sizes = [1, 8, 128], strides = [1, 1, 1]} : vector<8x8x128xf32> to vector<1x8x128xf32>
    %20 = vector.shape_cast %19 : vector<1x8x128xf32> to vector<8x128xf32>
    %21 = vector.broadcast %18 : f32 to vector<8x128xf32>
    %22 = arith.mulf %21, %20 : vector<8x128xf32>
    %c4 = arith.constant 4 : index
    %23 = memref.load %arg1[%c4] : memref<13xf32, #tpu.memory_space<smem>>
    %24 = vector.extract_strided_slice %2 {offsets = [3, 0, 0], sizes = [1, 8, 128], strides = [1, 1, 1]} : vector<8x8x128xf32> to vector<1x8x128xf32>
    %25 = vector.shape_cast %24 : vector<1x8x128xf32> to vector<8x128xf32>
    %26 = vector.broadcast %23 : f32 to vector<8x128xf32>
    %27 = arith.mulf %26, %25 : vector<8x128xf32>
    %c5 = arith.constant 5 : index
    %28 = memref.load %arg1[%c5] : memref<13xf32, #tpu.memory_space<smem>>
    %29 = vector.extract_strided_slice %2 {offsets = [3, 0, 0], sizes = [1, 8, 128], strides = [1, 1, 1]} : vector<8x8x128xf32> to vector<1x8x128xf32>
    %30 = vector.shape_cast %29 : vector<1x8x128xf32> to vector<8x128xf32>
    %31 = vector.broadcast %28 : f32 to vector<8x128xf32>
    %32 = arith.mulf %31, %30 : vector<8x128xf32>
    %c6 = arith.constant 6 : index
    %33 = memref.load %arg1[%c6] : memref<13xf32, #tpu.memory_space<smem>>
    %34 = vector.extract_strided_slice %2 {offsets = [3, 0, 0], sizes = [1, 8, 128], strides = [1, 1, 1]} : vector<8x8x128xf32> to vector<1x8x128xf32>
    %35 = vector.shape_cast %34 : vector<1x8x128xf32> to vector<8x128xf32>
    %36 = vector.broadcast %33 : f32 to vector<8x128xf32>
    %37 = arith.mulf %36, %35 : vector<8x128xf32>
    %c7 = arith.constant 7 : index
    %38 = memref.load %arg1[%c7] : memref<13xf32, #tpu.memory_space<smem>>
    %39 = vector.extract_strided_slice %2 {offsets = [4, 0, 0], sizes = [1, 8, 128], strides = [1, 1, 1]} : vector<8x8x128xf32> to vector<1x8x128xf32>
    %40 = vector.shape_cast %39 : vector<1x8x128xf32> to vector<8x128xf32>
    %41 = vector.broadcast %38 : f32 to vector<8x128xf32>
    %42 = arith.mulf %41, %40 : vector<8x128xf32>
    %43 = arith.addf %27, %42 : vector<8x128xf32>
    %c8 = arith.constant 8 : index
    %44 = memref.load %arg1[%c8] : memref<13xf32, #tpu.memory_space<smem>>
    %45 = vector.extract_strided_slice %2 {offsets = [4, 0, 0], sizes = [1, 8, 128], strides = [1, 1, 1]} : vector<8x8x128xf32> to vector<1x8x128xf32>
    %46 = vector.shape_cast %45 : vector<1x8x128xf32> to vector<8x128xf32>
    %47 = vector.broadcast %44 : f32 to vector<8x128xf32>
    %48 = arith.mulf %47, %46 : vector<8x128xf32>
    %49 = arith.addf %32, %48 : vector<8x128xf32>
    %c9 = arith.constant 9 : index
    %50 = memref.load %arg1[%c9] : memref<13xf32, #tpu.memory_space<smem>>
    %51 = vector.extract_strided_slice %2 {offsets = [5, 0, 0], sizes = [1, 8, 128], strides = [1, 1, 1]} : vector<8x8x128xf32> to vector<1x8x128xf32>
    %52 = vector.shape_cast %51 : vector<1x8x128xf32> to vector<8x128xf32>
    %53 = vector.broadcast %50 : f32 to vector<8x128xf32>
    %54 = arith.mulf %53, %52 : vector<8x128xf32>
    %55 = arith.addf %17, %54 : vector<8x128xf32>
    %c10 = arith.constant 10 : index
    %56 = memref.load %arg1[%c10] : memref<13xf32, #tpu.memory_space<smem>>
    %57 = vector.extract_strided_slice %2 {offsets = [5, 0, 0], sizes = [1, 8, 128], strides = [1, 1, 1]} : vector<8x8x128xf32> to vector<1x8x128xf32>
    %58 = vector.shape_cast %57 : vector<1x8x128xf32> to vector<8x128xf32>
    %59 = vector.broadcast %56 : f32 to vector<8x128xf32>
    %60 = arith.mulf %59, %58 : vector<8x128xf32>
    %61 = arith.addf %22, %60 : vector<8x128xf32>
    %c11 = arith.constant 11 : index
    %62 = memref.load %arg1[%c11] : memref<13xf32, #tpu.memory_space<smem>>
    %63 = vector.extract_strided_slice %2 {offsets = [6, 0, 0], sizes = [1, 8, 128], strides = [1, 1, 1]} : vector<8x8x128xf32> to vector<1x8x128xf32>
    %64 = vector.shape_cast %63 : vector<1x8x128xf32> to vector<8x128xf32>
    %65 = vector.broadcast %62 : f32 to vector<8x128xf32>
    %66 = arith.mulf %65, %64 : vector<8x128xf32>
    %c12 = arith.constant 12 : index
    %67 = memref.load %arg1[%c12] : memref<13xf32, #tpu.memory_space<smem>>
    %68 = vector.extract_strided_slice %2 {offsets = [7, 0, 0], sizes = [1, 8, 128], strides = [1, 1, 1]} : vector<8x8x128xf32> to vector<1x8x128xf32>
    %69 = vector.shape_cast %68 : vector<1x8x128xf32> to vector<8x128xf32>
    %70 = vector.broadcast %67 : f32 to vector<8x128xf32>
    %71 = arith.mulf %70, %69 : vector<8x128xf32>
    %cst = arith.constant 0.166666672 : f32
    %72 = vector.broadcast %cst : f32 to vector<8x128xf32>
    %73 = arith.mulf %43, %72 : vector<8x128xf32>
    %cst_3 = arith.constant 0.166666672 : f32
    %74 = vector.broadcast %cst_3 : f32 to vector<8x128xf32>
    %75 = arith.mulf %55, %74 : vector<8x128xf32>
    %cst_4 = arith.constant 0.166666672 : f32
    %76 = vector.broadcast %cst_4 : f32 to vector<8x128xf32>
    %77 = arith.mulf %7, %76 : vector<8x128xf32>
    %cst_5 = arith.constant 0.166666672 : f32
    %78 = vector.broadcast %cst_5 : f32 to vector<8x128xf32>
    %79 = arith.mulf %61, %78 : vector<8x128xf32>
    %cst_6 = arith.constant 0.166666672 : f32
    %80 = vector.broadcast %cst_6 : f32 to vector<8x128xf32>
    %81 = arith.mulf %49, %80 : vector<8x128xf32>
    %cst_7 = arith.constant 0.166666672 : f32
    %82 = vector.broadcast %cst_7 : f32 to vector<8x128xf32>
    %83 = arith.mulf %12, %82 : vector<8x128xf32>
    %cst_8 = arith.constant 0.166666672 : f32
    %84 = vector.broadcast %cst_8 : f32 to vector<8x128xf32>
    %85 = arith.mulf %66, %84 : vector<8x128xf32>
    %cst_9 = arith.constant 0.166666672 : f32
    %86 = vector.broadcast %cst_9 : f32 to vector<8x128xf32>
    %87 = arith.mulf %71, %86 : vector<8x128xf32>
    %cst_10 = arith.constant 0.166666672 : f32
    %88 = vector.broadcast %cst_10 : f32 to vector<8x128xf32>
    %89 = arith.mulf %37, %88 : vector<8x128xf32>
    %cst_11 = arith.constant 1.000000e+00 : f32
    %90 = vector.broadcast %cst_11 : f32 to vector<8x128xf32>
    %91 = arith.addf %73, %90 : vector<8x128xf32>
    %cst_12 = arith.constant 1.000000e+00 : f32
    %92 = vector.broadcast %cst_12 : f32 to vector<8x128xf32>
    %93 = arith.addf %81, %92 : vector<8x128xf32>
    %cst_13 = arith.constant 1.000000e+00 : f32
    %94 = vector.broadcast %cst_13 : f32 to vector<8x128xf32>
    %95 = arith.addf %89, %94 : vector<8x128xf32>
    %96 = arith.mulf %43, %91 : vector<8x128xf32>
    %cst_14 = arith.constant 0.000000e+00 : f32
    %97 = vector.broadcast %cst_14 : f32 to vector<8x128xf32>
    %98 = arith.addf %97, %96 : vector<8x128xf32>
    %99 = arith.mulf %55, %79 : vector<8x128xf32>
    %100 = arith.addf %98, %99 : vector<8x128xf32>
    %101 = arith.mulf %7, %85 : vector<8x128xf32>
    %102 = arith.addf %100, %101 : vector<8x128xf32>
    %103 = arith.mulf %43, %75 : vector<8x128xf32>
    %cst_15 = arith.constant 0.000000e+00 : f32
    %104 = vector.broadcast %cst_15 : f32 to vector<8x128xf32>
    %105 = arith.addf %104, %103 : vector<8x128xf32>
    %106 = arith.mulf %55, %93 : vector<8x128xf32>
    %107 = arith.addf %105, %106 : vector<8x128xf32>
    %108 = arith.mulf %7, %87 : vector<8x128xf32>
    %109 = arith.addf %107, %108 : vector<8x128xf32>
    %110 = arith.mulf %43, %77 : vector<8x128xf32>
    %cst_16 = arith.constant 0.000000e+00 : f32
    %111 = vector.broadcast %cst_16 : f32 to vector<8x128xf32>
    %112 = arith.addf %111, %110 : vector<8x128xf32>
    %113 = arith.mulf %55, %83 : vector<8x128xf32>
    %114 = arith.addf %112, %113 : vector<8x128xf32>
    %115 = arith.mulf %7, %95 : vector<8x128xf32>
    %116 = arith.addf %114, %115 : vector<8x128xf32>
    %117 = arith.mulf %61, %91 : vector<8x128xf32>
    %cst_17 = arith.constant 0.000000e+00 : f32
    %118 = vector.broadcast %cst_17 : f32 to vector<8x128xf32>
    %119 = arith.addf %118, %117 : vector<8x128xf32>
    %120 = arith.mulf %49, %79 : vector<8x128xf32>
    %121 = arith.addf %119, %120 : vector<8x128xf32>
    %122 = arith.mulf %12, %85 : vector<8x128xf32>
    %123 = arith.addf %121, %122 : vector<8x128xf32>
    %124 = arith.mulf %61, %75 : vector<8x128xf32>
    %cst_18 = arith.constant 0.000000e+00 : f32
    %125 = vector.broadcast %cst_18 : f32 to vector<8x128xf32>
    %126 = arith.addf %125, %124 : vector<8x128xf32>
    %127 = arith.mulf %49, %93 : vector<8x128xf32>
    %128 = arith.addf %126, %127 : vector<8x128xf32>
    %129 = arith.mulf %12, %87 : vector<8x128xf32>
    %130 = arith.addf %128, %129 : vector<8x128xf32>
    %131 = arith.mulf %61, %77 : vector<8x128xf32>
    %cst_19 = arith.constant 0.000000e+00 : f32
    %132 = vector.broadcast %cst_19 : f32 to vector<8x128xf32>
    %133 = arith.addf %132, %131 : vector<8x128xf32>
    %134 = arith.mulf %49, %83 : vector<8x128xf32>
    %135 = arith.addf %133, %134 : vector<8x128xf32>
    %136 = arith.mulf %12, %95 : vector<8x128xf32>
    %137 = arith.addf %135, %136 : vector<8x128xf32>
    %138 = arith.mulf %66, %91 : vector<8x128xf32>
    %cst_20 = arith.constant 0.000000e+00 : f32
    %139 = vector.broadcast %cst_20 : f32 to vector<8x128xf32>
    %140 = arith.addf %139, %138 : vector<8x128xf32>
    %141 = arith.mulf %71, %79 : vector<8x128xf32>
    %142 = arith.addf %140, %141 : vector<8x128xf32>
    %143 = arith.mulf %37, %85 : vector<8x128xf32>
    %144 = arith.addf %142, %143 : vector<8x128xf32>
    %145 = arith.mulf %66, %75 : vector<8x128xf32>
    %cst_21 = arith.constant 0.000000e+00 : f32
    %146 = vector.broadcast %cst_21 : f32 to vector<8x128xf32>
    %147 = arith.addf %146, %145 : vector<8x128xf32>
    %148 = arith.mulf %71, %93 : vector<8x128xf32>
    %149 = arith.addf %147, %148 : vector<8x128xf32>
    %150 = arith.mulf %37, %87 : vector<8x128xf32>
    %151 = arith.addf %149, %150 : vector<8x128xf32>
    %152 = arith.mulf %66, %77 : vector<8x128xf32>
    %cst_22 = arith.constant 0.000000e+00 : f32
    %153 = vector.broadcast %cst_22 : f32 to vector<8x128xf32>
    %154 = arith.addf %153, %152 : vector<8x128xf32>
    %155 = arith.mulf %71, %83 : vector<8x128xf32>
    %156 = arith.addf %154, %155 : vector<8x128xf32>
    %157 = arith.mulf %37, %95 : vector<8x128xf32>
    %158 = arith.addf %156, %157 : vector<8x128xf32>
    %cst_23 = arith.constant 2.000000e-01 : f32
    %159 = vector.broadcast %cst_23 : f32 to vector<8x128xf32>
    %160 = arith.mulf %102, %159 : vector<8x128xf32>
    %cst_24 = arith.constant 2.000000e-01 : f32
    %161 = vector.broadcast %cst_24 : f32 to vector<8x128xf32>
    %162 = arith.mulf %109, %161 : vector<8x128xf32>
    %cst_25 = arith.constant 2.000000e-01 : f32
    %163 = vector.broadcast %cst_25 : f32 to vector<8x128xf32>
    %164 = arith.mulf %116, %163 : vector<8x128xf32>
    %cst_26 = arith.constant 2.000000e-01 : f32
    %165 = vector.broadcast %cst_26 : f32 to vector<8x128xf32>
    %166 = arith.mulf %123, %165 : vector<8x128xf32>
    %cst_27 = arith.constant 2.000000e-01 : f32
    %167 = vector.broadcast %cst_27 : f32 to vector<8x128xf32>
    %168 = arith.mulf %130, %167 : vector<8x128xf32>
    %cst_28 = arith.constant 2.000000e-01 : f32
    %169 = vector.broadcast %cst_28 : f32 to vector<8x128xf32>
    %170 = arith.mulf %137, %169 : vector<8x128xf32>
    %cst_29 = arith.constant 2.000000e-01 : f32
    %171 = vector.broadcast %cst_29 : f32 to vector<8x128xf32>
    %172 = arith.mulf %144, %171 : vector<8x128xf32>
    %cst_30 = arith.constant 2.000000e-01 : f32
    %173 = vector.broadcast %cst_30 : f32 to vector<8x128xf32>
    %174 = arith.mulf %151, %173 : vector<8x128xf32>
    %cst_31 = arith.constant 2.000000e-01 : f32
    %175 = vector.broadcast %cst_31 : f32 to vector<8x128xf32>
    %176 = arith.mulf %158, %175 : vector<8x128xf32>
    %cst_32 = arith.constant 1.000000e+00 : f32
    %177 = vector.broadcast %cst_32 : f32 to vector<8x128xf32>
    %178 = arith.addf %160, %177 : vector<8x128xf32>
    %cst_33 = arith.constant 1.000000e+00 : f32
    %179 = vector.broadcast %cst_33 : f32 to vector<8x128xf32>
    %180 = arith.addf %168, %179 : vector<8x128xf32>
    %cst_34 = arith.constant 1.000000e+00 : f32
    %181 = vector.broadcast %cst_34 : f32 to vector<8x128xf32>
    %182 = arith.addf %176, %181 : vector<8x128xf32>
    %183 = arith.mulf %43, %178 : vector<8x128xf32>
    %cst_35 = arith.constant 0.000000e+00 : f32
    %184 = vector.broadcast %cst_35 : f32 to vector<8x128xf32>
    %185 = arith.addf %184, %183 : vector<8x128xf32>
    %186 = arith.mulf %55, %166 : vector<8x128xf32>
    %187 = arith.addf %185, %186 : vector<8x128xf32>
    %188 = arith.mulf %7, %172 : vector<8x128xf32>
    %189 = arith.addf %187, %188 : vector<8x128xf32>
    %190 = arith.mulf %43, %162 : vector<8x128xf32>
    %cst_36 = arith.constant 0.000000e+00 : f32
    %191 = vector.broadcast %cst_36 : f32 to vector<8x128xf32>
    %192 = arith.addf %191, %190 : vector<8x128xf32>
    %193 = arith.mulf %55, %180 : vector<8x128xf32>
    %194 = arith.addf %192, %193 : vector<8x128xf32>
    %195 = arith.mulf %7, %174 : vector<8x128xf32>
    %196 = arith.addf %194, %195 : vector<8x128xf32>
    %197 = arith.mulf %43, %164 : vector<8x128xf32>
    %cst_37 = arith.constant 0.000000e+00 : f32
    %198 = vector.broadcast %cst_37 : f32 to vector<8x128xf32>
    %199 = arith.addf %198, %197 : vector<8x128xf32>
    %200 = arith.mulf %55, %170 : vector<8x128xf32>
    %201 = arith.addf %199, %200 : vector<8x128xf32>
    %202 = arith.mulf %7, %182 : vector<8x128xf32>
    %203 = arith.addf %201, %202 : vector<8x128xf32>
    %204 = arith.mulf %61, %178 : vector<8x128xf32>
    %cst_38 = arith.constant 0.000000e+00 : f32
    %205 = vector.broadcast %cst_38 : f32 to vector<8x128xf32>
    %206 = arith.addf %205, %204 : vector<8x128xf32>
    %207 = arith.mulf %49, %166 : vector<8x128xf32>
    %208 = arith.addf %206, %207 : vector<8x128xf32>
    %209 = arith.mulf %12, %172 : vector<8x128xf32>
    %210 = arith.addf %208, %209 : vector<8x128xf32>
    %211 = arith.mulf %61, %162 : vector<8x128xf32>
    %cst_39 = arith.constant 0.000000e+00 : f32
    %212 = vector.broadcast %cst_39 : f32 to vector<8x128xf32>
    %213 = arith.addf %212, %211 : vector<8x128xf32>
    %214 = arith.mulf %49, %180 : vector<8x128xf32>
    %215 = arith.addf %213, %214 : vector<8x128xf32>
    %216 = arith.mulf %12, %174 : vector<8x128xf32>
    %217 = arith.addf %215, %216 : vector<8x128xf32>
    %218 = arith.mulf %61, %164 : vector<8x128xf32>
    %cst_40 = arith.constant 0.000000e+00 : f32
    %219 = vector.broadcast %cst_40 : f32 to vector<8x128xf32>
    %220 = arith.addf %219, %218 : vector<8x128xf32>
    %221 = arith.mulf %49, %170 : vector<8x128xf32>
    %222 = arith.addf %220, %221 : vector<8x128xf32>
    %223 = arith.mulf %12, %182 : vector<8x128xf32>
    %224 = arith.addf %222, %223 : vector<8x128xf32>
    %225 = arith.mulf %66, %178 : vector<8x128xf32>
    %cst_41 = arith.constant 0.000000e+00 : f32
    %226 = vector.broadcast %cst_41 : f32 to vector<8x128xf32>
    %227 = arith.addf %226, %225 : vector<8x128xf32>
    %228 = arith.mulf %71, %166 : vector<8x128xf32>
    %229 = arith.addf %227, %228 : vector<8x128xf32>
    %230 = arith.mulf %37, %172 : vector<8x128xf32>
    %231 = arith.addf %229, %230 : vector<8x128xf32>
    %232 = arith.mulf %66, %162 : vector<8x128xf32>
    %cst_42 = arith.constant 0.000000e+00 : f32
    %233 = vector.broadcast %cst_42 : f32 to vector<8x128xf32>
    %234 = arith.addf %233, %232 : vector<8x128xf32>
    %235 = arith.mulf %71, %180 : vector<8x128xf32>
    %236 = arith.addf %234, %235 : vector<8x128xf32>
    %237 = arith.mulf %37, %174 : vector<8x128xf32>
    %238 = arith.addf %236, %237 : vector<8x128xf32>
    %239 = arith.mulf %66, %164 : vector<8x128xf32>
    %cst_43 = arith.constant 0.000000e+00 : f32
    %240 = vector.broadcast %cst_43 : f32 to vector<8x128xf32>
    %241 = arith.addf %240, %239 : vector<8x128xf32>
    %242 = arith.mulf %71, %170 : vector<8x128xf32>
    %243 = arith.addf %241, %242 : vector<8x128xf32>
    %244 = arith.mulf %37, %182 : vector<8x128xf32>
    %245 = arith.addf %243, %244 : vector<8x128xf32>
    %cst_44 = arith.constant 2.500000e-01 : f32
    %246 = vector.broadcast %cst_44 : f32 to vector<8x128xf32>
    %247 = arith.mulf %189, %246 : vector<8x128xf32>
    %cst_45 = arith.constant 2.500000e-01 : f32
    %248 = vector.broadcast %cst_45 : f32 to vector<8x128xf32>
    %249 = arith.mulf %196, %248 : vector<8x128xf32>
    %cst_46 = arith.constant 2.500000e-01 : f32
    %250 = vector.broadcast %cst_46 : f32 to vector<8x128xf32>
    %251 = arith.mulf %203, %250 : vector<8x128xf32>
    %cst_47 = arith.constant 2.500000e-01 : f32
    %252 = vector.broadcast %cst_47 : f32 to vector<8x128xf32>
    %253 = arith.mulf %210, %252 : vector<8x128xf32>
    %cst_48 = arith.constant 2.500000e-01 : f32
    %254 = vector.broadcast %cst_48 : f32 to vector<8x128xf32>
    %255 = arith.mulf %217, %254 : vector<8x128xf32>
    %cst_49 = arith.constant 2.500000e-01 : f32
    %256 = vector.broadcast %cst_49 : f32 to vector<8x128xf32>
    %257 = arith.mulf %224, %256 : vector<8x128xf32>
    %cst_50 = arith.constant 2.500000e-01 : f32
    %258 = vector.broadcast %cst_50 : f32 to vector<8x128xf32>
    %259 = arith.mulf %231, %258 : vector<8x128xf32>
    %cst_51 = arith.constant 2.500000e-01 : f32
    %260 = vector.broadcast %cst_51 : f32 to vector<8x128xf32>
    %261 = arith.mulf %238, %260 : vector<8x128xf32>
    %cst_52 = arith.constant 2.500000e-01 : f32
    %262 = vector.broadcast %cst_52 : f32 to vector<8x128xf32>
    %263 = arith.mulf %245, %262 : vector<8x128xf32>
    %cst_53 = arith.constant 1.000000e+00 : f32
    %264 = vector.broadcast %cst_53 : f32 to vector<8x128xf32>
    %265 = arith.addf %247, %264 : vector<8x128xf32>
    %cst_54 = arith.constant 1.000000e+00 : f32
    %266 = vector.broadcast %cst_54 : f32 to vector<8x128xf32>
    %267 = arith.addf %255, %266 : vector<8x128xf32>
    %cst_55 = arith.constant 1.000000e+00 : f32
    %268 = vector.broadcast %cst_55 : f32 to vector<8x128xf32>
    %269 = arith.addf %263, %268 : vector<8x128xf32>
    %270 = arith.mulf %43, %265 : vector<8x128xf32>
    %cst_56 = arith.constant 0.000000e+00 : f32
    %271 = vector.broadcast %cst_56 : f32 to vector<8x128xf32>
    %272 = arith.addf %271, %270 : vector<8x128xf32>
    %273 = arith.mulf %55, %253 : vector<8x128xf32>
    %274 = arith.addf %272, %273 : vector<8x128xf32>
    %275 = arith.mulf %7, %259 : vector<8x128xf32>
    %276 = arith.addf %274, %275 : vector<8x128xf32>
    %277 = arith.mulf %43, %249 : vector<8x128xf32>
    %cst_57 = arith.constant 0.000000e+00 : f32
    %278 = vector.broadcast %cst_57 : f32 to vector<8x128xf32>
    %279 = arith.addf %278, %277 : vector<8x128xf32>
    %280 = arith.mulf %55, %267 : vector<8x128xf32>
    %281 = arith.addf %279, %280 : vector<8x128xf32>
    %282 = arith.mulf %7, %261 : vector<8x128xf32>
    %283 = arith.addf %281, %282 : vector<8x128xf32>
    %284 = arith.mulf %43, %251 : vector<8x128xf32>
    %cst_58 = arith.constant 0.000000e+00 : f32
    %285 = vector.broadcast %cst_58 : f32 to vector<8x128xf32>
    %286 = arith.addf %285, %284 : vector<8x128xf32>
    %287 = arith.mulf %55, %257 : vector<8x128xf32>
    %288 = arith.addf %286, %287 : vector<8x128xf32>
    %289 = arith.mulf %7, %269 : vector<8x128xf32>
    %290 = arith.addf %288, %289 : vector<8x128xf32>
    %291 = arith.mulf %61, %265 : vector<8x128xf32>
    %cst_59 = arith.constant 0.000000e+00 : f32
    %292 = vector.broadcast %cst_59 : f32 to vector<8x128xf32>
    %293 = arith.addf %292, %291 : vector<8x128xf32>
    %294 = arith.mulf %49, %253 : vector<8x128xf32>
    %295 = arith.addf %293, %294 : vector<8x128xf32>
    %296 = arith.mulf %12, %259 : vector<8x128xf32>
    %297 = arith.addf %295, %296 : vector<8x128xf32>
    %298 = arith.mulf %61, %249 : vector<8x128xf32>
    %cst_60 = arith.constant 0.000000e+00 : f32
    %299 = vector.broadcast %cst_60 : f32 to vector<8x128xf32>
    %300 = arith.addf %299, %298 : vector<8x128xf32>
    %301 = arith.mulf %49, %267 : vector<8x128xf32>
    %302 = arith.addf %300, %301 : vector<8x128xf32>
    %303 = arith.mulf %12, %261 : vector<8x128xf32>
    %304 = arith.addf %302, %303 : vector<8x128xf32>
    %305 = arith.mulf %61, %251 : vector<8x128xf32>
    %cst_61 = arith.constant 0.000000e+00 : f32
    %306 = vector.broadcast %cst_61 : f32 to vector<8x128xf32>
    %307 = arith.addf %306, %305 : vector<8x128xf32>
    %308 = arith.mulf %49, %257 : vector<8x128xf32>
    %309 = arith.addf %307, %308 : vector<8x128xf32>
    %310 = arith.mulf %12, %269 : vector<8x128xf32>
    %311 = arith.addf %309, %310 : vector<8x128xf32>
    %312 = arith.mulf %66, %265 : vector<8x128xf32>
    %cst_62 = arith.constant 0.000000e+00 : f32
    %313 = vector.broadcast %cst_62 : f32 to vector<8x128xf32>
    %314 = arith.addf %313, %312 : vector<8x128xf32>
    %315 = arith.mulf %71, %253 : vector<8x128xf32>
    %316 = arith.addf %314, %315 : vector<8x128xf32>
    %317 = arith.mulf %37, %259 : vector<8x128xf32>
    %318 = arith.addf %316, %317 : vector<8x128xf32>
    %319 = arith.mulf %66, %249 : vector<8x128xf32>
    %cst_63 = arith.constant 0.000000e+00 : f32
    %320 = vector.broadcast %cst_63 : f32 to vector<8x128xf32>
    %321 = arith.addf %320, %319 : vector<8x128xf32>
    %322 = arith.mulf %71, %267 : vector<8x128xf32>
    %323 = arith.addf %321, %322 : vector<8x128xf32>
    %324 = arith.mulf %37, %261 : vector<8x128xf32>
    %325 = arith.addf %323, %324 : vector<8x128xf32>
    %326 = arith.mulf %66, %251 : vector<8x128xf32>
    %cst_64 = arith.constant 0.000000e+00 : f32
    %327 = vector.broadcast %cst_64 : f32 to vector<8x128xf32>
    %328 = arith.addf %327, %326 : vector<8x128xf32>
    %329 = arith.mulf %71, %257 : vector<8x128xf32>
    %330 = arith.addf %328, %329 : vector<8x128xf32>
    %331 = arith.mulf %37, %269 : vector<8x128xf32>
    %332 = arith.addf %330, %331 : vector<8x128xf32>
    %cst_65 = arith.constant 0.333333343 : f32
    %333 = vector.broadcast %cst_65 : f32 to vector<8x128xf32>
    %334 = arith.mulf %276, %333 : vector<8x128xf32>
    %cst_66 = arith.constant 0.333333343 : f32
    %335 = vector.broadcast %cst_66 : f32 to vector<8x128xf32>
    %336 = arith.mulf %283, %335 : vector<8x128xf32>
    %cst_67 = arith.constant 0.333333343 : f32
    %337 = vector.broadcast %cst_67 : f32 to vector<8x128xf32>
    %338 = arith.mulf %290, %337 : vector<8x128xf32>
    %cst_68 = arith.constant 0.333333343 : f32
    %339 = vector.broadcast %cst_68 : f32 to vector<8x128xf32>
    %340 = arith.mulf %297, %339 : vector<8x128xf32>
    %cst_69 = arith.constant 0.333333343 : f32
    %341 = vector.broadcast %cst_69 : f32 to vector<8x128xf32>
    %342 = arith.mulf %304, %341 : vector<8x128xf32>
    %cst_70 = arith.constant 0.333333343 : f32
    %343 = vector.broadcast %cst_70 : f32 to vector<8x128xf32>
    %344 = arith.mulf %311, %343 : vector<8x128xf32>
    %cst_71 = arith.constant 0.333333343 : f32
    %345 = vector.broadcast %cst_71 : f32 to vector<8x128xf32>
    %346 = arith.mulf %318, %345 : vector<8x128xf32>
    %cst_72 = arith.constant 0.333333343 : f32
    %347 = vector.broadcast %cst_72 : f32 to vector<8x128xf32>
    %348 = arith.mulf %325, %347 : vector<8x128xf32>
    %cst_73 = arith.constant 0.333333343 : f32
    %349 = vector.broadcast %cst_73 : f32 to vector<8x128xf32>
    %350 = arith.mulf %332, %349 : vector<8x128xf32>
    %cst_74 = arith.constant 1.000000e+00 : f32
    %351 = vector.broadcast %cst_74 : f32 to vector<8x128xf32>
    %352 = arith.addf %334, %351 : vector<8x128xf32>
    %cst_75 = arith.constant 1.000000e+00 : f32
    %353 = vector.broadcast %cst_75 : f32 to vector<8x128xf32>
    %354 = arith.addf %342, %353 : vector<8x128xf32>
    %cst_76 = arith.constant 1.000000e+00 : f32
    %355 = vector.broadcast %cst_76 : f32 to vector<8x128xf32>
    %356 = arith.addf %350, %355 : vector<8x128xf32>
    %357 = arith.mulf %43, %352 : vector<8x128xf32>
    %cst_77 = arith.constant 0.000000e+00 : f32
    %358 = vector.broadcast %cst_77 : f32 to vector<8x128xf32>
    %359 = arith.addf %358, %357 : vector<8x128xf32>
    %360 = arith.mulf %55, %340 : vector<8x128xf32>
    %361 = arith.addf %359, %360 : vector<8x128xf32>
    %362 = arith.mulf %7, %346 : vector<8x128xf32>
    %363 = arith.addf %361, %362 : vector<8x128xf32>
    %364 = arith.mulf %43, %336 : vector<8x128xf32>
    %cst_78 = arith.constant 0.000000e+00 : f32
    %365 = vector.broadcast %cst_78 : f32 to vector<8x128xf32>
    %366 = arith.addf %365, %364 : vector<8x128xf32>
    %367 = arith.mulf %55, %354 : vector<8x128xf32>
    %368 = arith.addf %366, %367 : vector<8x128xf32>
    %369 = arith.mulf %7, %348 : vector<8x128xf32>
    %370 = arith.addf %368, %369 : vector<8x128xf32>
    %371 = arith.mulf %43, %338 : vector<8x128xf32>
    %cst_79 = arith.constant 0.000000e+00 : f32
    %372 = vector.broadcast %cst_79 : f32 to vector<8x128xf32>
    %373 = arith.addf %372, %371 : vector<8x128xf32>
    %374 = arith.mulf %55, %344 : vector<8x128xf32>
    %375 = arith.addf %373, %374 : vector<8x128xf32>
    %376 = arith.mulf %7, %356 : vector<8x128xf32>
    %377 = arith.addf %375, %376 : vector<8x128xf32>
    %378 = arith.mulf %61, %352 : vector<8x128xf32>
    %cst_80 = arith.constant 0.000000e+00 : f32
    %379 = vector.broadcast %cst_80 : f32 to vector<8x128xf32>
    %380 = arith.addf %379, %378 : vector<8x128xf32>
    %381 = arith.mulf %49, %340 : vector<8x128xf32>
    %382 = arith.addf %380, %381 : vector<8x128xf32>
    %383 = arith.mulf %12, %346 : vector<8x128xf32>
    %384 = arith.addf %382, %383 : vector<8x128xf32>
    %385 = arith.mulf %61, %336 : vector<8x128xf32>
    %cst_81 = arith.constant 0.000000e+00 : f32
    %386 = vector.broadcast %cst_81 : f32 to vector<8x128xf32>
    %387 = arith.addf %386, %385 : vector<8x128xf32>
    %388 = arith.mulf %49, %354 : vector<8x128xf32>
    %389 = arith.addf %387, %388 : vector<8x128xf32>
    %390 = arith.mulf %12, %348 : vector<8x128xf32>
    %391 = arith.addf %389, %390 : vector<8x128xf32>
    %392 = arith.mulf %61, %338 : vector<8x128xf32>
    %cst_82 = arith.constant 0.000000e+00 : f32
    %393 = vector.broadcast %cst_82 : f32 to vector<8x128xf32>
    %394 = arith.addf %393, %392 : vector<8x128xf32>
    %395 = arith.mulf %49, %344 : vector<8x128xf32>
    %396 = arith.addf %394, %395 : vector<8x128xf32>
    %397 = arith.mulf %12, %356 : vector<8x128xf32>
    %398 = arith.addf %396, %397 : vector<8x128xf32>
    %399 = arith.mulf %66, %352 : vector<8x128xf32>
    %cst_83 = arith.constant 0.000000e+00 : f32
    %400 = vector.broadcast %cst_83 : f32 to vector<8x128xf32>
    %401 = arith.addf %400, %399 : vector<8x128xf32>
    %402 = arith.mulf %71, %340 : vector<8x128xf32>
    %403 = arith.addf %401, %402 : vector<8x128xf32>
    %404 = arith.mulf %37, %346 : vector<8x128xf32>
    %405 = arith.addf %403, %404 : vector<8x128xf32>
    %406 = arith.mulf %66, %336 : vector<8x128xf32>
    %cst_84 = arith.constant 0.000000e+00 : f32
    %407 = vector.broadcast %cst_84 : f32 to vector<8x128xf32>
    %408 = arith.addf %407, %406 : vector<8x128xf32>
    %409 = arith.mulf %71, %354 : vector<8x128xf32>
    %410 = arith.addf %408, %409 : vector<8x128xf32>
    %411 = arith.mulf %37, %348 : vector<8x128xf32>
    %412 = arith.addf %410, %411 : vector<8x128xf32>
    %413 = arith.mulf %66, %338 : vector<8x128xf32>
    %cst_85 = arith.constant 0.000000e+00 : f32
    %414 = vector.broadcast %cst_85 : f32 to vector<8x128xf32>
    %415 = arith.addf %414, %413 : vector<8x128xf32>
    %416 = arith.mulf %71, %344 : vector<8x128xf32>
    %417 = arith.addf %415, %416 : vector<8x128xf32>
    %418 = arith.mulf %37, %356 : vector<8x128xf32>
    %419 = arith.addf %417, %418 : vector<8x128xf32>
    %cst_86 = arith.constant 5.000000e-01 : f32
    %420 = vector.broadcast %cst_86 : f32 to vector<8x128xf32>
    %421 = arith.mulf %363, %420 : vector<8x128xf32>
    %cst_87 = arith.constant 5.000000e-01 : f32
    %422 = vector.broadcast %cst_87 : f32 to vector<8x128xf32>
    %423 = arith.mulf %370, %422 : vector<8x128xf32>
    %cst_88 = arith.constant 5.000000e-01 : f32
    %424 = vector.broadcast %cst_88 : f32 to vector<8x128xf32>
    %425 = arith.mulf %377, %424 : vector<8x128xf32>
    %cst_89 = arith.constant 5.000000e-01 : f32
    %426 = vector.broadcast %cst_89 : f32 to vector<8x128xf32>
    %427 = arith.mulf %384, %426 : vector<8x128xf32>
    %cst_90 = arith.constant 5.000000e-01 : f32
    %428 = vector.broadcast %cst_90 : f32 to vector<8x128xf32>
    %429 = arith.mulf %391, %428 : vector<8x128xf32>
    %cst_91 = arith.constant 5.000000e-01 : f32
    %430 = vector.broadcast %cst_91 : f32 to vector<8x128xf32>
    %431 = arith.mulf %398, %430 : vector<8x128xf32>
    %cst_92 = arith.constant 5.000000e-01 : f32
    %432 = vector.broadcast %cst_92 : f32 to vector<8x128xf32>
    %433 = arith.mulf %405, %432 : vector<8x128xf32>
    %cst_93 = arith.constant 5.000000e-01 : f32
    %434 = vector.broadcast %cst_93 : f32 to vector<8x128xf32>
    %435 = arith.mulf %412, %434 : vector<8x128xf32>
    %cst_94 = arith.constant 5.000000e-01 : f32
    %436 = vector.broadcast %cst_94 : f32 to vector<8x128xf32>
    %437 = arith.mulf %419, %436 : vector<8x128xf32>
    %cst_95 = arith.constant 1.000000e+00 : f32
    %438 = vector.broadcast %cst_95 : f32 to vector<8x128xf32>
    %439 = arith.addf %421, %438 : vector<8x128xf32>
    %cst_96 = arith.constant 1.000000e+00 : f32
    %440 = vector.broadcast %cst_96 : f32 to vector<8x128xf32>
    %441 = arith.addf %429, %440 : vector<8x128xf32>
    %cst_97 = arith.constant 1.000000e+00 : f32
    %442 = vector.broadcast %cst_97 : f32 to vector<8x128xf32>
    %443 = arith.addf %437, %442 : vector<8x128xf32>
    %444 = arith.mulf %43, %439 : vector<8x128xf32>
    %cst_98 = arith.constant 0.000000e+00 : f32
    %445 = vector.broadcast %cst_98 : f32 to vector<8x128xf32>
    %446 = arith.addf %445, %444 : vector<8x128xf32>
    %447 = arith.mulf %55, %427 : vector<8x128xf32>
    %448 = arith.addf %446, %447 : vector<8x128xf32>
    %449 = arith.mulf %7, %433 : vector<8x128xf32>
    %450 = arith.addf %448, %449 : vector<8x128xf32>
    %451 = arith.mulf %43, %423 : vector<8x128xf32>
    %cst_99 = arith.constant 0.000000e+00 : f32
    %452 = vector.broadcast %cst_99 : f32 to vector<8x128xf32>
    %453 = arith.addf %452, %451 : vector<8x128xf32>
    %454 = arith.mulf %55, %441 : vector<8x128xf32>
    %455 = arith.addf %453, %454 : vector<8x128xf32>
    %456 = arith.mulf %7, %435 : vector<8x128xf32>
    %457 = arith.addf %455, %456 : vector<8x128xf32>
    %458 = arith.mulf %43, %425 : vector<8x128xf32>
    %cst_100 = arith.constant 0.000000e+00 : f32
    %459 = vector.broadcast %cst_100 : f32 to vector<8x128xf32>
    %460 = arith.addf %459, %458 : vector<8x128xf32>
    %461 = arith.mulf %55, %431 : vector<8x128xf32>
    %462 = arith.addf %460, %461 : vector<8x128xf32>
    %463 = arith.mulf %7, %443 : vector<8x128xf32>
    %464 = arith.addf %462, %463 : vector<8x128xf32>
    %465 = arith.mulf %61, %439 : vector<8x128xf32>
    %cst_101 = arith.constant 0.000000e+00 : f32
    %466 = vector.broadcast %cst_101 : f32 to vector<8x128xf32>
    %467 = arith.addf %466, %465 : vector<8x128xf32>
    %468 = arith.mulf %49, %427 : vector<8x128xf32>
    %469 = arith.addf %467, %468 : vector<8x128xf32>
    %470 = arith.mulf %12, %433 : vector<8x128xf32>
    %471 = arith.addf %469, %470 : vector<8x128xf32>
    %472 = arith.mulf %61, %423 : vector<8x128xf32>
    %cst_102 = arith.constant 0.000000e+00 : f32
    %473 = vector.broadcast %cst_102 : f32 to vector<8x128xf32>
    %474 = arith.addf %473, %472 : vector<8x128xf32>
    %475 = arith.mulf %49, %441 : vector<8x128xf32>
    %476 = arith.addf %474, %475 : vector<8x128xf32>
    %477 = arith.mulf %12, %435 : vector<8x128xf32>
    %478 = arith.addf %476, %477 : vector<8x128xf32>
    %479 = arith.mulf %61, %425 : vector<8x128xf32>
    %cst_103 = arith.constant 0.000000e+00 : f32
    %480 = vector.broadcast %cst_103 : f32 to vector<8x128xf32>
    %481 = arith.addf %480, %479 : vector<8x128xf32>
    %482 = arith.mulf %49, %431 : vector<8x128xf32>
    %483 = arith.addf %481, %482 : vector<8x128xf32>
    %484 = arith.mulf %12, %443 : vector<8x128xf32>
    %485 = arith.addf %483, %484 : vector<8x128xf32>
    %486 = arith.mulf %66, %439 : vector<8x128xf32>
    %cst_104 = arith.constant 0.000000e+00 : f32
    %487 = vector.broadcast %cst_104 : f32 to vector<8x128xf32>
    %488 = arith.addf %487, %486 : vector<8x128xf32>
    %489 = arith.mulf %71, %427 : vector<8x128xf32>
    %490 = arith.addf %488, %489 : vector<8x128xf32>
    %491 = arith.mulf %37, %433 : vector<8x128xf32>
    %492 = arith.addf %490, %491 : vector<8x128xf32>
    %493 = arith.mulf %66, %423 : vector<8x128xf32>
    %cst_105 = arith.constant 0.000000e+00 : f32
    %494 = vector.broadcast %cst_105 : f32 to vector<8x128xf32>
    %495 = arith.addf %494, %493 : vector<8x128xf32>
    %496 = arith.mulf %71, %441 : vector<8x128xf32>
    %497 = arith.addf %495, %496 : vector<8x128xf32>
    %498 = arith.mulf %37, %435 : vector<8x128xf32>
    %499 = arith.addf %497, %498 : vector<8x128xf32>
    %500 = arith.mulf %66, %425 : vector<8x128xf32>
    %cst_106 = arith.constant 0.000000e+00 : f32
    %501 = vector.broadcast %cst_106 : f32 to vector<8x128xf32>
    %502 = arith.addf %501, %500 : vector<8x128xf32>
    %503 = arith.mulf %71, %431 : vector<8x128xf32>
    %504 = arith.addf %502, %503 : vector<8x128xf32>
    %505 = arith.mulf %37, %443 : vector<8x128xf32>
    %506 = arith.addf %504, %505 : vector<8x128xf32>
    %cst_107 = arith.constant 1.000000e+00 : f32
    %507 = vector.broadcast %cst_107 : f32 to vector<8x128xf32>
    %508 = arith.addf %450, %507 : vector<8x128xf32>
    %cst_108 = arith.constant 1.000000e+00 : f32
    %509 = vector.broadcast %cst_108 : f32 to vector<8x128xf32>
    %510 = arith.addf %478, %509 : vector<8x128xf32>
    %cst_109 = arith.constant 1.000000e+00 : f32
    %511 = vector.broadcast %cst_109 : f32 to vector<8x128xf32>
    %512 = arith.addf %506, %511 : vector<8x128xf32>
    %513 = arith.mulf %508, %508 : vector<8x128xf32>
    %cst_110 = arith.constant 0.000000e+00 : f32
    %514 = vector.broadcast %cst_110 : f32 to vector<8x128xf32>
    %515 = arith.addf %514, %513 : vector<8x128xf32>
    %516 = arith.mulf %457, %471 : vector<8x128xf32>
    %517 = arith.addf %515, %516 : vector<8x128xf32>
    %518 = arith.mulf %464, %492 : vector<8x128xf32>
    %519 = arith.addf %517, %518 : vector<8x128xf32>
    %520 = arith.mulf %508, %457 : vector<8x128xf32>
    %cst_111 = arith.constant 0.000000e+00 : f32
    %521 = vector.broadcast %cst_111 : f32 to vector<8x128xf32>
    %522 = arith.addf %521, %520 : vector<8x128xf32>
    %523 = arith.mulf %457, %510 : vector<8x128xf32>
    %524 = arith.addf %522, %523 : vector<8x128xf32>
    %525 = arith.mulf %464, %499 : vector<8x128xf32>
    %526 = arith.addf %524, %525 : vector<8x128xf32>
    %527 = arith.mulf %508, %464 : vector<8x128xf32>
    %cst_112 = arith.constant 0.000000e+00 : f32
    %528 = vector.broadcast %cst_112 : f32 to vector<8x128xf32>
    %529 = arith.addf %528, %527 : vector<8x128xf32>
    %530 = arith.mulf %457, %485 : vector<8x128xf32>
    %531 = arith.addf %529, %530 : vector<8x128xf32>
    %532 = arith.mulf %464, %512 : vector<8x128xf32>
    %533 = arith.addf %531, %532 : vector<8x128xf32>
    %534 = arith.mulf %471, %508 : vector<8x128xf32>
    %cst_113 = arith.constant 0.000000e+00 : f32
    %535 = vector.broadcast %cst_113 : f32 to vector<8x128xf32>
    %536 = arith.addf %535, %534 : vector<8x128xf32>
    %537 = arith.mulf %510, %471 : vector<8x128xf32>
    %538 = arith.addf %536, %537 : vector<8x128xf32>
    %539 = arith.mulf %485, %492 : vector<8x128xf32>
    %540 = arith.addf %538, %539 : vector<8x128xf32>
    %541 = arith.mulf %471, %457 : vector<8x128xf32>
    %cst_114 = arith.constant 0.000000e+00 : f32
    %542 = vector.broadcast %cst_114 : f32 to vector<8x128xf32>
    %543 = arith.addf %542, %541 : vector<8x128xf32>
    %544 = arith.mulf %510, %510 : vector<8x128xf32>
    %545 = arith.addf %543, %544 : vector<8x128xf32>
    %546 = arith.mulf %485, %499 : vector<8x128xf32>
    %547 = arith.addf %545, %546 : vector<8x128xf32>
    %548 = arith.mulf %471, %464 : vector<8x128xf32>
    %cst_115 = arith.constant 0.000000e+00 : f32
    %549 = vector.broadcast %cst_115 : f32 to vector<8x128xf32>
    %550 = arith.addf %549, %548 : vector<8x128xf32>
    %551 = arith.mulf %510, %485 : vector<8x128xf32>
    %552 = arith.addf %550, %551 : vector<8x128xf32>
    %553 = arith.mulf %485, %512 : vector<8x128xf32>
    %554 = arith.addf %552, %553 : vector<8x128xf32>
    %555 = arith.mulf %492, %508 : vector<8x128xf32>
    %cst_116 = arith.constant 0.000000e+00 : f32
    %556 = vector.broadcast %cst_116 : f32 to vector<8x128xf32>
    %557 = arith.addf %556, %555 : vector<8x128xf32>
    %558 = arith.mulf %499, %471 : vector<8x128xf32>
    %559 = arith.addf %557, %558 : vector<8x128xf32>
    %560 = arith.mulf %512, %492 : vector<8x128xf32>
    %561 = arith.addf %559, %560 : vector<8x128xf32>
    %562 = arith.mulf %492, %457 : vector<8x128xf32>
    %cst_117 = arith.constant 0.000000e+00 : f32
    %563 = vector.broadcast %cst_117 : f32 to vector<8x128xf32>
    %564 = arith.addf %563, %562 : vector<8x128xf32>
    %565 = arith.mulf %499, %510 : vector<8x128xf32>
    %566 = arith.addf %564, %565 : vector<8x128xf32>
    %567 = arith.mulf %512, %499 : vector<8x128xf32>
    %568 = arith.addf %566, %567 : vector<8x128xf32>
    %569 = arith.mulf %492, %464 : vector<8x128xf32>
    %cst_118 = arith.constant 0.000000e+00 : f32
    %570 = vector.broadcast %cst_118 : f32 to vector<8x128xf32>
    %571 = arith.addf %570, %569 : vector<8x128xf32>
    %572 = arith.mulf %499, %485 : vector<8x128xf32>
    %573 = arith.addf %571, %572 : vector<8x128xf32>
    %574 = arith.mulf %512, %512 : vector<8x128xf32>
    %575 = arith.addf %573, %574 : vector<8x128xf32>
    %576 = arith.mulf %519, %519 : vector<8x128xf32>
    %cst_119 = arith.constant 0.000000e+00 : f32
    %577 = vector.broadcast %cst_119 : f32 to vector<8x128xf32>
    %578 = arith.addf %577, %576 : vector<8x128xf32>
    %579 = arith.mulf %526, %540 : vector<8x128xf32>
    %580 = arith.addf %578, %579 : vector<8x128xf32>
    %581 = arith.mulf %533, %561 : vector<8x128xf32>
    %582 = arith.addf %580, %581 : vector<8x128xf32>
    %583 = arith.mulf %519, %526 : vector<8x128xf32>
    %cst_120 = arith.constant 0.000000e+00 : f32
    %584 = vector.broadcast %cst_120 : f32 to vector<8x128xf32>
    %585 = arith.addf %584, %583 : vector<8x128xf32>
    %586 = arith.mulf %526, %547 : vector<8x128xf32>
    %587 = arith.addf %585, %586 : vector<8x128xf32>
    %588 = arith.mulf %533, %568 : vector<8x128xf32>
    %589 = arith.addf %587, %588 : vector<8x128xf32>
    %590 = arith.mulf %519, %533 : vector<8x128xf32>
    %cst_121 = arith.constant 0.000000e+00 : f32
    %591 = vector.broadcast %cst_121 : f32 to vector<8x128xf32>
    %592 = arith.addf %591, %590 : vector<8x128xf32>
    %593 = arith.mulf %526, %554 : vector<8x128xf32>
    %594 = arith.addf %592, %593 : vector<8x128xf32>
    %595 = arith.mulf %533, %575 : vector<8x128xf32>
    %596 = arith.addf %594, %595 : vector<8x128xf32>
    %597 = arith.mulf %540, %519 : vector<8x128xf32>
    %cst_122 = arith.constant 0.000000e+00 : f32
    %598 = vector.broadcast %cst_122 : f32 to vector<8x128xf32>
    %599 = arith.addf %598, %597 : vector<8x128xf32>
    %600 = arith.mulf %547, %540 : vector<8x128xf32>
    %601 = arith.addf %599, %600 : vector<8x128xf32>
    %602 = arith.mulf %554, %561 : vector<8x128xf32>
    %603 = arith.addf %601, %602 : vector<8x128xf32>
    %604 = arith.mulf %540, %526 : vector<8x128xf32>
    %cst_123 = arith.constant 0.000000e+00 : f32
    %605 = vector.broadcast %cst_123 : f32 to vector<8x128xf32>
    %606 = arith.addf %605, %604 : vector<8x128xf32>
    %607 = arith.mulf %547, %547 : vector<8x128xf32>
    %608 = arith.addf %606, %607 : vector<8x128xf32>
    %609 = arith.mulf %554, %568 : vector<8x128xf32>
    %610 = arith.addf %608, %609 : vector<8x128xf32>
    %611 = arith.mulf %540, %533 : vector<8x128xf32>
    %cst_124 = arith.constant 0.000000e+00 : f32
    %612 = vector.broadcast %cst_124 : f32 to vector<8x128xf32>
    %613 = arith.addf %612, %611 : vector<8x128xf32>
    %614 = arith.mulf %547, %554 : vector<8x128xf32>
    %615 = arith.addf %613, %614 : vector<8x128xf32>
    %616 = arith.mulf %554, %575 : vector<8x128xf32>
    %617 = arith.addf %615, %616 : vector<8x128xf32>
    %618 = arith.mulf %561, %519 : vector<8x128xf32>
    %cst_125 = arith.constant 0.000000e+00 : f32
    %619 = vector.broadcast %cst_125 : f32 to vector<8x128xf32>
    %620 = arith.addf %619, %618 : vector<8x128xf32>
    %621 = arith.mulf %568, %540 : vector<8x128xf32>
    %622 = arith.addf %620, %621 : vector<8x128xf32>
    %623 = arith.mulf %575, %561 : vector<8x128xf32>
    %624 = arith.addf %622, %623 : vector<8x128xf32>
    %625 = arith.mulf %561, %526 : vector<8x128xf32>
    %cst_126 = arith.constant 0.000000e+00 : f32
    %626 = vector.broadcast %cst_126 : f32 to vector<8x128xf32>
    %627 = arith.addf %626, %625 : vector<8x128xf32>
    %628 = arith.mulf %568, %547 : vector<8x128xf32>
    %629 = arith.addf %627, %628 : vector<8x128xf32>
    %630 = arith.mulf %575, %568 : vector<8x128xf32>
    %631 = arith.addf %629, %630 : vector<8x128xf32>
    %632 = arith.mulf %561, %533 : vector<8x128xf32>
    %cst_127 = arith.constant 0.000000e+00 : f32
    %633 = vector.broadcast %cst_127 : f32 to vector<8x128xf32>
    %634 = arith.addf %633, %632 : vector<8x128xf32>
    %635 = arith.mulf %568, %554 : vector<8x128xf32>
    %636 = arith.addf %634, %635 : vector<8x128xf32>
    %637 = arith.mulf %575, %575 : vector<8x128xf32>
    %638 = arith.addf %636, %637 : vector<8x128xf32>
    %639 = arith.mulf %582, %582 : vector<8x128xf32>
    %cst_128 = arith.constant 0.000000e+00 : f32
    %640 = vector.broadcast %cst_128 : f32 to vector<8x128xf32>
    %641 = arith.addf %640, %639 : vector<8x128xf32>
    %642 = arith.mulf %589, %603 : vector<8x128xf32>
    %643 = arith.addf %641, %642 : vector<8x128xf32>
    %644 = arith.mulf %596, %624 : vector<8x128xf32>
    %645 = arith.addf %643, %644 : vector<8x128xf32>
    %646 = arith.mulf %582, %589 : vector<8x128xf32>
    %cst_129 = arith.constant 0.000000e+00 : f32
    %647 = vector.broadcast %cst_129 : f32 to vector<8x128xf32>
    %648 = arith.addf %647, %646 : vector<8x128xf32>
    %649 = arith.mulf %589, %610 : vector<8x128xf32>
    %650 = arith.addf %648, %649 : vector<8x128xf32>
    %651 = arith.mulf %596, %631 : vector<8x128xf32>
    %652 = arith.addf %650, %651 : vector<8x128xf32>
    %653 = arith.mulf %582, %596 : vector<8x128xf32>
    %cst_130 = arith.constant 0.000000e+00 : f32
    %654 = vector.broadcast %cst_130 : f32 to vector<8x128xf32>
    %655 = arith.addf %654, %653 : vector<8x128xf32>
    %656 = arith.mulf %589, %617 : vector<8x128xf32>
    %657 = arith.addf %655, %656 : vector<8x128xf32>
    %658 = arith.mulf %596, %638 : vector<8x128xf32>
    %659 = arith.addf %657, %658 : vector<8x128xf32>
    %660 = arith.mulf %603, %582 : vector<8x128xf32>
    %cst_131 = arith.constant 0.000000e+00 : f32
    %661 = vector.broadcast %cst_131 : f32 to vector<8x128xf32>
    %662 = arith.addf %661, %660 : vector<8x128xf32>
    %663 = arith.mulf %610, %603 : vector<8x128xf32>
    %664 = arith.addf %662, %663 : vector<8x128xf32>
    %665 = arith.mulf %617, %624 : vector<8x128xf32>
    %666 = arith.addf %664, %665 : vector<8x128xf32>
    %667 = arith.mulf %603, %589 : vector<8x128xf32>
    %cst_132 = arith.constant 0.000000e+00 : f32
    %668 = vector.broadcast %cst_132 : f32 to vector<8x128xf32>
    %669 = arith.addf %668, %667 : vector<8x128xf32>
    %670 = arith.mulf %610, %610 : vector<8x128xf32>
    %671 = arith.addf %669, %670 : vector<8x128xf32>
    %672 = arith.mulf %617, %631 : vector<8x128xf32>
    %673 = arith.addf %671, %672 : vector<8x128xf32>
    %674 = arith.mulf %603, %596 : vector<8x128xf32>
    %cst_133 = arith.constant 0.000000e+00 : f32
    %675 = vector.broadcast %cst_133 : f32 to vector<8x128xf32>
    %676 = arith.addf %675, %674 : vector<8x128xf32>
    %677 = arith.mulf %610, %617 : vector<8x128xf32>
    %678 = arith.addf %676, %677 : vector<8x128xf32>
    %679 = arith.mulf %617, %638 : vector<8x128xf32>
    %680 = arith.addf %678, %679 : vector<8x128xf32>
    %681 = arith.mulf %624, %582 : vector<8x128xf32>
    %cst_134 = arith.constant 0.000000e+00 : f32
    %682 = vector.broadcast %cst_134 : f32 to vector<8x128xf32>
    %683 = arith.addf %682, %681 : vector<8x128xf32>
    %684 = arith.mulf %631, %603 : vector<8x128xf32>
    %685 = arith.addf %683, %684 : vector<8x128xf32>
    %686 = arith.mulf %638, %624 : vector<8x128xf32>
    %687 = arith.addf %685, %686 : vector<8x128xf32>
    %688 = arith.mulf %624, %589 : vector<8x128xf32>
    %cst_135 = arith.constant 0.000000e+00 : f32
    %689 = vector.broadcast %cst_135 : f32 to vector<8x128xf32>
    %690 = arith.addf %689, %688 : vector<8x128xf32>
    %691 = arith.mulf %631, %610 : vector<8x128xf32>
    %692 = arith.addf %690, %691 : vector<8x128xf32>
    %693 = arith.mulf %638, %631 : vector<8x128xf32>
    %694 = arith.addf %692, %693 : vector<8x128xf32>
    %695 = arith.mulf %624, %596 : vector<8x128xf32>
    %cst_136 = arith.constant 0.000000e+00 : f32
    %696 = vector.broadcast %cst_136 : f32 to vector<8x128xf32>
    %697 = arith.addf %696, %695 : vector<8x128xf32>
    %698 = arith.mulf %631, %617 : vector<8x128xf32>
    %699 = arith.addf %697, %698 : vector<8x128xf32>
    %700 = arith.mulf %638, %638 : vector<8x128xf32>
    %701 = arith.addf %699, %700 : vector<8x128xf32>
    %702 = arith.mulf %645, %645 : vector<8x128xf32>
    %cst_137 = arith.constant 0.000000e+00 : f32
    %703 = vector.broadcast %cst_137 : f32 to vector<8x128xf32>
    %704 = arith.addf %703, %702 : vector<8x128xf32>
    %705 = arith.mulf %652, %666 : vector<8x128xf32>
    %706 = arith.addf %704, %705 : vector<8x128xf32>
    %707 = arith.mulf %659, %687 : vector<8x128xf32>
    %708 = arith.addf %706, %707 : vector<8x128xf32>
    %709 = arith.mulf %645, %652 : vector<8x128xf32>
    %cst_138 = arith.constant 0.000000e+00 : f32
    %710 = vector.broadcast %cst_138 : f32 to vector<8x128xf32>
    %711 = arith.addf %710, %709 : vector<8x128xf32>
    %712 = arith.mulf %652, %673 : vector<8x128xf32>
    %713 = arith.addf %711, %712 : vector<8x128xf32>
    %714 = arith.mulf %659, %694 : vector<8x128xf32>
    %715 = arith.addf %713, %714 : vector<8x128xf32>
    %716 = arith.mulf %645, %659 : vector<8x128xf32>
    %cst_139 = arith.constant 0.000000e+00 : f32
    %717 = vector.broadcast %cst_139 : f32 to vector<8x128xf32>
    %718 = arith.addf %717, %716 : vector<8x128xf32>
    %719 = arith.mulf %652, %680 : vector<8x128xf32>
    %720 = arith.addf %718, %719 : vector<8x128xf32>
    %721 = arith.mulf %659, %701 : vector<8x128xf32>
    %722 = arith.addf %720, %721 : vector<8x128xf32>
    %723 = arith.mulf %666, %645 : vector<8x128xf32>
    %cst_140 = arith.constant 0.000000e+00 : f32
    %724 = vector.broadcast %cst_140 : f32 to vector<8x128xf32>
    %725 = arith.addf %724, %723 : vector<8x128xf32>
    %726 = arith.mulf %673, %666 : vector<8x128xf32>
    %727 = arith.addf %725, %726 : vector<8x128xf32>
    %728 = arith.mulf %680, %687 : vector<8x128xf32>
    %729 = arith.addf %727, %728 : vector<8x128xf32>
    %730 = arith.mulf %666, %652 : vector<8x128xf32>
    %cst_141 = arith.constant 0.000000e+00 : f32
    %731 = vector.broadcast %cst_141 : f32 to vector<8x128xf32>
    %732 = arith.addf %731, %730 : vector<8x128xf32>
    %733 = arith.mulf %673, %673 : vector<8x128xf32>
    %734 = arith.addf %732, %733 : vector<8x128xf32>
    %735 = arith.mulf %680, %694 : vector<8x128xf32>
    %736 = arith.addf %734, %735 : vector<8x128xf32>
    %737 = arith.mulf %666, %659 : vector<8x128xf32>
    %cst_142 = arith.constant 0.000000e+00 : f32
    %738 = vector.broadcast %cst_142 : f32 to vector<8x128xf32>
    %739 = arith.addf %738, %737 : vector<8x128xf32>
    %740 = arith.mulf %673, %680 : vector<8x128xf32>
    %741 = arith.addf %739, %740 : vector<8x128xf32>
    %742 = arith.mulf %680, %701 : vector<8x128xf32>
    %743 = arith.addf %741, %742 : vector<8x128xf32>
    %744 = arith.mulf %687, %645 : vector<8x128xf32>
    %cst_143 = arith.constant 0.000000e+00 : f32
    %745 = vector.broadcast %cst_143 : f32 to vector<8x128xf32>
    %746 = arith.addf %745, %744 : vector<8x128xf32>
    %747 = arith.mulf %694, %666 : vector<8x128xf32>
    %748 = arith.addf %746, %747 : vector<8x128xf32>
    %749 = arith.mulf %701, %687 : vector<8x128xf32>
    %750 = arith.addf %748, %749 : vector<8x128xf32>
    %751 = arith.mulf %687, %652 : vector<8x128xf32>
    %cst_144 = arith.constant 0.000000e+00 : f32
    %752 = vector.broadcast %cst_144 : f32 to vector<8x128xf32>
    %753 = arith.addf %752, %751 : vector<8x128xf32>
    %754 = arith.mulf %694, %673 : vector<8x128xf32>
    %755 = arith.addf %753, %754 : vector<8x128xf32>
    %756 = arith.mulf %701, %694 : vector<8x128xf32>
    %757 = arith.addf %755, %756 : vector<8x128xf32>
    %758 = arith.mulf %687, %659 : vector<8x128xf32>
    %cst_145 = arith.constant 0.000000e+00 : f32
    %759 = vector.broadcast %cst_145 : f32 to vector<8x128xf32>
    %760 = arith.addf %759, %758 : vector<8x128xf32>
    %761 = arith.mulf %694, %680 : vector<8x128xf32>
    %762 = arith.addf %760, %761 : vector<8x128xf32>
    %763 = arith.mulf %701, %701 : vector<8x128xf32>
    %764 = arith.addf %762, %763 : vector<8x128xf32>
    %765 = arith.mulf %708, %708 : vector<8x128xf32>
    %cst_146 = arith.constant 0.000000e+00 : f32
    %766 = vector.broadcast %cst_146 : f32 to vector<8x128xf32>
    %767 = arith.addf %766, %765 : vector<8x128xf32>
    %768 = arith.mulf %715, %729 : vector<8x128xf32>
    %769 = arith.addf %767, %768 : vector<8x128xf32>
    %770 = arith.mulf %722, %750 : vector<8x128xf32>
    %771 = arith.addf %769, %770 : vector<8x128xf32>
    %772 = arith.mulf %708, %715 : vector<8x128xf32>
    %cst_147 = arith.constant 0.000000e+00 : f32
    %773 = vector.broadcast %cst_147 : f32 to vector<8x128xf32>
    %774 = arith.addf %773, %772 : vector<8x128xf32>
    %775 = arith.mulf %715, %736 : vector<8x128xf32>
    %776 = arith.addf %774, %775 : vector<8x128xf32>
    %777 = arith.mulf %722, %757 : vector<8x128xf32>
    %778 = arith.addf %776, %777 : vector<8x128xf32>
    %779 = arith.mulf %708, %722 : vector<8x128xf32>
    %cst_148 = arith.constant 0.000000e+00 : f32
    %780 = vector.broadcast %cst_148 : f32 to vector<8x128xf32>
    %781 = arith.addf %780, %779 : vector<8x128xf32>
    %782 = arith.mulf %715, %743 : vector<8x128xf32>
    %783 = arith.addf %781, %782 : vector<8x128xf32>
    %784 = arith.mulf %722, %764 : vector<8x128xf32>
    %785 = arith.addf %783, %784 : vector<8x128xf32>
    %786 = arith.mulf %729, %708 : vector<8x128xf32>
    %cst_149 = arith.constant 0.000000e+00 : f32
    %787 = vector.broadcast %cst_149 : f32 to vector<8x128xf32>
    %788 = arith.addf %787, %786 : vector<8x128xf32>
    %789 = arith.mulf %736, %729 : vector<8x128xf32>
    %790 = arith.addf %788, %789 : vector<8x128xf32>
    %791 = arith.mulf %743, %750 : vector<8x128xf32>
    %792 = arith.addf %790, %791 : vector<8x128xf32>
    %793 = arith.mulf %729, %715 : vector<8x128xf32>
    %cst_150 = arith.constant 0.000000e+00 : f32
    %794 = vector.broadcast %cst_150 : f32 to vector<8x128xf32>
    %795 = arith.addf %794, %793 : vector<8x128xf32>
    %796 = arith.mulf %736, %736 : vector<8x128xf32>
    %797 = arith.addf %795, %796 : vector<8x128xf32>
    %798 = arith.mulf %743, %757 : vector<8x128xf32>
    %799 = arith.addf %797, %798 : vector<8x128xf32>
    %800 = arith.mulf %729, %722 : vector<8x128xf32>
    %cst_151 = arith.constant 0.000000e+00 : f32
    %801 = vector.broadcast %cst_151 : f32 to vector<8x128xf32>
    %802 = arith.addf %801, %800 : vector<8x128xf32>
    %803 = arith.mulf %736, %743 : vector<8x128xf32>
    %804 = arith.addf %802, %803 : vector<8x128xf32>
    %805 = arith.mulf %743, %764 : vector<8x128xf32>
    %806 = arith.addf %804, %805 : vector<8x128xf32>
    %807 = arith.mulf %750, %708 : vector<8x128xf32>
    %cst_152 = arith.constant 0.000000e+00 : f32
    %808 = vector.broadcast %cst_152 : f32 to vector<8x128xf32>
    %809 = arith.addf %808, %807 : vector<8x128xf32>
    %810 = arith.mulf %757, %729 : vector<8x128xf32>
    %811 = arith.addf %809, %810 : vector<8x128xf32>
    %812 = arith.mulf %764, %750 : vector<8x128xf32>
    %813 = arith.addf %811, %812 : vector<8x128xf32>
    %814 = arith.mulf %750, %715 : vector<8x128xf32>
    %cst_153 = arith.constant 0.000000e+00 : f32
    %815 = vector.broadcast %cst_153 : f32 to vector<8x128xf32>
    %816 = arith.addf %815, %814 : vector<8x128xf32>
    %817 = arith.mulf %757, %736 : vector<8x128xf32>
    %818 = arith.addf %816, %817 : vector<8x128xf32>
    %819 = arith.mulf %764, %757 : vector<8x128xf32>
    %820 = arith.addf %818, %819 : vector<8x128xf32>
    %821 = arith.mulf %750, %722 : vector<8x128xf32>
    %cst_154 = arith.constant 0.000000e+00 : f32
    %822 = vector.broadcast %cst_154 : f32 to vector<8x128xf32>
    %823 = arith.addf %822, %821 : vector<8x128xf32>
    %824 = arith.mulf %757, %743 : vector<8x128xf32>
    %825 = arith.addf %823, %824 : vector<8x128xf32>
    %826 = arith.mulf %764, %764 : vector<8x128xf32>
    %827 = arith.addf %825, %826 : vector<8x128xf32>
    %828 = tpu.reciprocal %827 {approx = true} : vector<8x128xf32> -> vector<8x128xf32>
    %829 = arith.mulf %827, %828 : vector<8x128xf32>
    %cst_155 = arith.constant 2.000000e+00 : f32
    %830 = vector.broadcast %cst_155 : f32 to vector<8x128xf32>
    %831 = arith.subf %830, %829 : vector<8x128xf32>
    %832 = arith.mulf %828, %831 : vector<8x128xf32>
    %833 = arith.mulf %771, %832 : vector<8x128xf32>
    %834 = arith.index_cast %c0_i32 : i32 to index
    %c0_156 = arith.constant 0 : index
    %c0_157 = arith.constant 0 : index
    %c0_158 = arith.constant 0 : index
    %835 = vector.load %arg3[%834, %c0_156, %c0_157, %c0_158] : memref<1x9x8x128xf32, #tpu.memory_space<vmem>>, vector<1x1x8x128xf32>
    %836 = vector.shape_cast %835 : vector<1x1x8x128xf32> to vector<8x128xf32>
    %837 = vector.shape_cast %833 : vector<8x128xf32> to vector<1x1x8x128xf32>
    tpu.vector_store %arg3[%834, %c0_156, %c0_157, %c0_158], %837 {strides = array<i32>} : memref<1x9x8x128xf32, #tpu.memory_space<vmem>>, vector<1x1x8x128xf32>,
    %838 = arith.mulf %778, %832 : vector<8x128xf32>
    %839 = arith.index_cast %c0_i32 : i32 to index
    %c1_159 = arith.constant 1 : index
    %c0_160 = arith.constant 0 : index
    %c0_161 = arith.constant 0 : index
    %840 = vector.load %arg3[%839, %c1_159, %c0_160, %c0_161] : memref<1x9x8x128xf32, #tpu.memory_space<vmem>>, vector<1x1x8x128xf32>
    %841 = vector.shape_cast %840 : vector<1x1x8x128xf32> to vector<8x128xf32>
    %842 = vector.shape_cast %838 : vector<8x128xf32> to vector<1x1x8x128xf32>
    tpu.vector_store %arg3[%839, %c1_159, %c0_160, %c0_161], %842 {strides = array<i32>} : memref<1x9x8x128xf32, #tpu.memory_space<vmem>>, vector<1x1x8x128xf32>,
    %843 = arith.mulf %785, %832 : vector<8x128xf32>
    %844 = arith.index_cast %c0_i32 : i32 to index
    %c2_162 = arith.constant 2 : index
    %c0_163 = arith.constant 0 : index
    %c0_164 = arith.constant 0 : index
    %845 = vector.load %arg3[%844, %c2_162, %c0_163, %c0_164] : memref<1x9x8x128xf32, #tpu.memory_space<vmem>>, vector<1x1x8x128xf32>
    %846 = vector.shape_cast %845 : vector<1x1x8x128xf32> to vector<8x128xf32>
    %847 = vector.shape_cast %843 : vector<8x128xf32> to vector<1x1x8x128xf32>
    tpu.vector_store %arg3[%844, %c2_162, %c0_163, %c0_164], %847 {strides = array<i32>} : memref<1x9x8x128xf32, #tpu.memory_space<vmem>>, vector<1x1x8x128xf32>,
    %848 = arith.mulf %792, %832 : vector<8x128xf32>
    %849 = arith.index_cast %c0_i32 : i32 to index
    %c3_165 = arith.constant 3 : index
    %c0_166 = arith.constant 0 : index
    %c0_167 = arith.constant 0 : index
    %850 = vector.load %arg3[%849, %c3_165, %c0_166, %c0_167] : memref<1x9x8x128xf32, #tpu.memory_space<vmem>>, vector<1x1x8x128xf32>
    %851 = vector.shape_cast %850 : vector<1x1x8x128xf32> to vector<8x128xf32>
    %852 = vector.shape_cast %848 : vector<8x128xf32> to vector<1x1x8x128xf32>
    tpu.vector_store %arg3[%849, %c3_165, %c0_166, %c0_167], %852 {strides = array<i32>} : memref<1x9x8x128xf32, #tpu.memory_space<vmem>>, vector<1x1x8x128xf32>,
    %853 = arith.mulf %799, %832 : vector<8x128xf32>
    %854 = arith.index_cast %c0_i32 : i32 to index
    %c4_168 = arith.constant 4 : index
    %c0_169 = arith.constant 0 : index
    %c0_170 = arith.constant 0 : index
    %855 = vector.load %arg3[%854, %c4_168, %c0_169, %c0_170] : memref<1x9x8x128xf32, #tpu.memory_space<vmem>>, vector<1x1x8x128xf32>
    %856 = vector.shape_cast %855 : vector<1x1x8x128xf32> to vector<8x128xf32>
    %857 = vector.shape_cast %853 : vector<8x128xf32> to vector<1x1x8x128xf32>
    tpu.vector_store %arg3[%854, %c4_168, %c0_169, %c0_170], %857 {strides = array<i32>} : memref<1x9x8x128xf32, #tpu.memory_space<vmem>>, vector<1x1x8x128xf32>,
    %858 = arith.mulf %806, %832 : vector<8x128xf32>
    %859 = arith.index_cast %c0_i32 : i32 to index
    %c5_171 = arith.constant 5 : index
    %c0_172 = arith.constant 0 : index
    %c0_173 = arith.constant 0 : index
    %860 = vector.load %arg3[%859, %c5_171, %c0_172, %c0_173] : memref<1x9x8x128xf32, #tpu.memory_space<vmem>>, vector<1x1x8x128xf32>
    %861 = vector.shape_cast %860 : vector<1x1x8x128xf32> to vector<8x128xf32>
    %862 = vector.shape_cast %858 : vector<8x128xf32> to vector<1x1x8x128xf32>
    tpu.vector_store %arg3[%859, %c5_171, %c0_172, %c0_173], %862 {strides = array<i32>} : memref<1x9x8x128xf32, #tpu.memory_space<vmem>>, vector<1x1x8x128xf32>,
    %863 = arith.mulf %813, %832 : vector<8x128xf32>
    %864 = arith.index_cast %c0_i32 : i32 to index
    %c6_174 = arith.constant 6 : index
    %c0_175 = arith.constant 0 : index
    %c0_176 = arith.constant 0 : index
    %865 = vector.load %arg3[%864, %c6_174, %c0_175, %c0_176] : memref<1x9x8x128xf32, #tpu.memory_space<vmem>>, vector<1x1x8x128xf32>
    %866 = vector.shape_cast %865 : vector<1x1x8x128xf32> to vector<8x128xf32>
    %867 = vector.shape_cast %863 : vector<8x128xf32> to vector<1x1x8x128xf32>
    tpu.vector_store %arg3[%864, %c6_174, %c0_175, %c0_176], %867 {strides = array<i32>} : memref<1x9x8x128xf32, #tpu.memory_space<vmem>>, vector<1x1x8x128xf32>,
    %868 = arith.mulf %820, %832 : vector<8x128xf32>
    %869 = arith.index_cast %c0_i32 : i32 to index
    %c7_177 = arith.constant 7 : index
    %c0_178 = arith.constant 0 : index
    %c0_179 = arith.constant 0 : index
    %870 = vector.load %arg3[%869, %c7_177, %c0_178, %c0_179] : memref<1x9x8x128xf32, #tpu.memory_space<vmem>>, vector<1x1x8x128xf32>
    %871 = vector.shape_cast %870 : vector<1x1x8x128xf32> to vector<8x128xf32>
    %872 = vector.shape_cast %868 : vector<8x128xf32> to vector<1x1x8x128xf32>
    tpu.vector_store %arg3[%869, %c7_177, %c0_178, %c0_179], %872 {strides = array<i32>} : memref<1x9x8x128xf32, #tpu.memory_space<vmem>>, vector<1x1x8x128xf32>,
    %873 = arith.mulf %827, %832 : vector<8x128xf32>
    %874 = arith.index_cast %c0_i32 : i32 to index
    %c8_180 = arith.constant 8 : index
    %c0_181 = arith.constant 0 : index
    %c0_182 = arith.constant 0 : index
    %875 = vector.load %arg3[%874, %c8_180, %c0_181, %c0_182] : memref<1x9x8x128xf32, #tpu.memory_space<vmem>>, vector<1x1x8x128xf32>
    %876 = vector.shape_cast %875 : vector<1x1x8x128xf32> to vector<8x128xf32>
    %877 = vector.shape_cast %873 : vector<8x128xf32> to vector<1x1x8x128xf32>
    tpu.vector_store %arg3[%874, %c8_180, %c0_181, %c0_182], %877 {strides = array<i32>} : memref<1x9x8x128xf32, #tpu.memory_space<vmem>>, vector<1x1x8x128xf32>,
    %c1_i32 = arith.constant 1 : i32
    return
  }
  func.func @transform_0(%arg0: i32) -> i32 {
    %c0_i32 = arith.constant 0 : i32
    %c0_i32_0 = arith.constant 0 : i32
    return %c0_i32 : i32
  }
  func.func @transform_1(%arg0: i32) -> (i32, i32, i32, i32) {
    %c0_i32 = arith.constant 0 : i32
    %c0_i32_0 = arith.constant 0 : i32
    %c0_i32_1 = arith.constant 0 : i32
    %c0_i32_2 = arith.constant 0 : i32
    return %arg0, %c0_i32, %c0_i32_0, %c0_i32_1 : i32, i32, i32, i32
  }
  func.func @transform_2(%arg0: i32) -> (i32, i32, i32, i32) {
    %c0_i32 = arith.constant 0 : i32
    %c0_i32_0 = arith.constant 0 : i32
    %c0_i32_1 = arith.constant 0 : i32
    %c0_i32_2 = arith.constant 0 : i32
    return %arg0, %c0_i32, %c0_i32_0, %c0_i32_1 : i32, i32, i32, i32
  }
}

</mosaic_0001>

<bundles_post_ra>
// kernel: lie_homographies_forward.1
= control target key start
LH: loop header
LB: loop body
LE: loop exit
PB: predicated region body
PF: predicated region fallthrough
CT: control target
= control target key end

     0   :  { %7 = vsyncpa [#allocation3], 0  ;;  %s735_s12 = smov [#allocation2]   ;;  %s984_s0 = inlined_call_operand.vmem [shape: f32[13], index: 0, kind: input, shape index: {}]   ;;  %s985_s1 = inlined_call_operand.vmem [shape: f32[1,8,8,128], index: 1, kind: input, shape index: {}]   ;;  %s986_s2 = inlined_call_operand.vmem [shape: f32[1,9,8,128], index: 2, kind: output, shape index: {}]  }
   0x1   :  { %s13_s11 = sshll.u32 %s984_s0, 4  ;;  %s14_s11 = int_to_ptr.vmem [resolvable:$true] %s13_s11 }
   0x2   :  { %16 = dma.vmem_to_smem %s14_s11, 16, %s735_s12, [#allocation3]  }
   0x3   :  { %733 = dma.done.wait [#allocation3], 16  }
   0x4   :  { %734 = vsyncadd [#allocation3], 4294967280 }
   0x5   :  { %23 = sfence }
   0x6   :  { %s32_s13 = sld [smem:[#allocation2]]  ;;  %v24_v0 = vld [vmem:[%s985_s1] sm:$0xff]  ;;  %v27_v1 = vld [vmem:[%s985_s1 + $0x18] sm:$0xff]  ;;  %v25_v3 = vld [vmem:[%s985_s1 + $0x8] sm:$0xff] }
   0x7   :  { %s698_s14 = sld [smem:[#allocation2 + $0x1]]  ;;  %v26_v6 = vld [vmem:[%s985_s1 + $0x10] sm:$0xff]  ;;  %v28_v7 = vld [vmem:[%s985_s1 + $0x20] sm:$0xff]  ;;  %v29_v14 = vld [vmem:[%s985_s1 + $0x28] sm:$0xff] }
   0x8   :  { %s754_s15 = sld [smem:[#allocation2 + $0x2]]  ;;  %v30_v23 = vld [vmem:[%s985_s1 + $0x30] sm:$0xff]  ;;  %v31_v28 = vld [vmem:[%s985_s1 + $0x38] sm:$0xff] }
   0x9   :  { %s756_s16 = sld [smem:[#allocation2 + $0x3]] }
   0xa   :  { %s701_s17 = sld [smem:[#allocation2 + $0x4]] }
   0xb   :  { %s702_s18 = sld [smem:[#allocation2 + $0x5]] }
   0xc   :  { %s703_s19 = sld [smem:[#allocation2 + $0x6]]  ;;  %v33_v2 = vstv %s32_s13 }
   0xd   :  { %s704_s20 = sld [smem:[#allocation2 + $0x7]]  ;;  %v36_v4 = vstv %s698_s14  ;;  %v778_v10 = vmul.f32 %v33_v2, %v24_v0 }
   0xe   :  { %s705_s21 = sld [smem:[#allocation2 + $0x8]]  ;;  %v39_v8 = vstv %s754_s15  ;;  %v784_v15 = vmul.f32 %v36_v4, %v25_v3 }
   0xf   :  { %s764_s25 = sld [smem:[#allocation2 + $0x9]]  ;;  %v42_v11 = vstv %s756_s16  ;;  %v40_v19 = vmul.f32 %v39_v8, %v26_v6  ;;  %v789_v22 = vmul.f32 0.16666667, %v778_v10 }
  0x10   :  { %v45_v5 = vstv %s701_s17  ;;  %s769_s28 = sld [smem:[#allocation2 + $0xa]]  ;;  %v43_v24 = vmul.f32 %v42_v11, %v26_v6  ;;  %v80_v32 = vmul.f32 0.16666667, %v784_v15 }
  0x11   :  { %v48_v9 = vstv %s702_s18  ;;  %s708_s5 = sld [smem:[#allocation2 + $0xb]]  ;;  %v46_v12 = vmul.f32 %v45_v5, %v27_v1 }
  0x12   :  { %v51_v13 = vstv %s703_s19  ;;  %s709_s6 = sld [smem:[#allocation2 + $0xc]]  ;;  %v49_v16 = vmul.f32 %v48_v9, %v27_v1 }
  0x13   :  { %v786_v17 = vmul.f32 %v51_v13, %v27_v1  ;;  %v54_v18 = vstv %s704_s20 }
  0x14   :  { %v55_v20 = vmul.f32 %v54_v18, %v28_v7  ;;  %v58_v21 = vstv %s705_s21 }
  0x15   :  { %v59_v25 = vmul.f32 %v58_v21, %v28_v7  ;;  %v62_v26 = vstv %s764_s25  ;;  %v83_v27 = vmul.f32 0.16666667, %v786_v17 }
  0x16   :  { %v799_v29 = vadd.f32 %v55_v20, %v46_v12  ;;  %v63_v30 = vmul.f32 %v62_v26, %v29_v14  ;;  %v66_v31 = vstv %s769_s28 }
  0x17   :  { %v803_v33 = vadd.f32 %v59_v25, %v49_v16  ;;  %v67_v34 = vmul.f32 %v66_v31, %v29_v14  ;;  %v70_v35 = vstv %s708_s5  ;;  %v86_v36 = vadd.f32 1.0, %v83_v27 }
  0x18   :  { %v805_v37 = vadd.f32 %v63_v30, %v40_v19  ;;  %v807_v38 = vmul.f32 %v70_v35, %v30_v23  ;;  %v73_v39 = vstv %s709_s6  ;;  %v75_v40 = vmul.f32 0.16666667, %v799_v29 }
  0x19   :  { %v810_v41 = vadd.f32 %v67_v34, %v43_v24  ;;  %v812_v42 = vmul.f32 %v73_v39, %v31_v28  ;;  %v79_v43 = vmul.f32 0.16666667, %v803_v33  ;;  %v99_v44 = vmul.f32 %v789_v22, %v799_v29 }
  0x1a   :  { %v76_v45 = vmul.f32 0.16666667, %v805_v37  ;;  %v81_v46 = vmul.f32 0.16666667, %v807_v38  ;;  %v84_v47 = vadd.f32 1.0, %v75_v40  ;;  %v101_v48 = vmul.f32 %v80_v32, %v805_v37 }
  0x1b   :  { %v78_v49 = vmul.f32 0.16666667, %v810_v41  ;;  %v82_v50 = vmul.f32 0.16666667, %v812_v42  ;;  %v85_v51 = vadd.f32 1.0, %v79_v43  ;;  %v103_v52 = vmul.f32 %v86_v36, %v778_v10 }
  0x1c   :  { %v87_v53 = vmul.f32 %v84_v47, %v799_v29  ;;  %v91_v54 = vmul.f32 %v81_v46, %v778_v10  ;;  %v93_v55 = vmul.f32 %v76_v45, %v799_v29  ;;  %v102_v56 = vadd.f32 %v101_v48, %v99_v44 }
  0x1d   :  { %v89_v57 = vmul.f32 %v78_v49, %v805_v37  ;;  %v95_v58 = vmul.f32 %v85_v51, %v805_v37  ;;  %v97_v59 = vmul.f32 %v82_v50, %v778_v10  ;;  %v105_v60 = vmul.f32 %v84_v47, %v810_v41 }
  0x1e   :  { %v104_v61 = vadd.f32 %v103_v52, %v102_v56  ;;  %v107_v62 = vmul.f32 %v78_v49, %v803_v33  ;;  %v109_v63 = vmul.f32 %v81_v46, %v784_v15  ;;  %v111_v0 = vmul.f32 %v76_v45, %v810_v41 }
  0x1f   :  { %v90_v1 = vadd.f32 %v89_v57, %v87_v53  ;;  %v96_v2 = vadd.f32 %v95_v58, %v93_v55  ;;  %v113_v3 = vmul.f32 %v85_v51, %v803_v33  ;;  %v115_v4 = vmul.f32 %v82_v50, %v784_v15 }
  0x20   :  { %v108_v5 = vadd.f32 %v107_v62, %v105_v60  ;;  %v117_v6 = vmul.f32 %v789_v22, %v810_v41  ;;  %v119_v7 = vmul.f32 %v80_v32, %v803_v33  ;;  %v121_v8 = vmul.f32 %v86_v36, %v784_v15 }
  0x21   :  { %v92_v9 = vadd.f32 %v91_v54, %v90_v1  ;;  %v98_v11 = vadd.f32 %v97_v59, %v96_v2  ;;  %v114_v12 = vadd.f32 %v113_v3, %v111_v0  ;;  %v123_v13 = vmul.f32 %v84_v47, %v807_v38 }
  0x22   :  { %v110_v14 = vadd.f32 %v109_v63, %v108_v5  ;;  %v120_v16 = vadd.f32 %v119_v7, %v117_v6  ;;  %v125_v18 = vmul.f32 %v78_v49, %v812_v42  ;;  %v127_v19 = vmul.f32 %v81_v46, %v786_v17 }
  0x23   :  { %v116_v20 = vadd.f32 %v115_v4, %v114_v12  ;;  %v129_v21 = vmul.f32 %v76_v45, %v807_v38  ;;  %v131_v23 = vmul.f32 %v85_v51, %v812_v42  ;;  %v133_v24 = vmul.f32 %v82_v50, %v786_v17 }
  0x24   :  { %v122_v25 = vadd.f32 %v121_v8, %v120_v16  ;;  %v126_v26 = vadd.f32 %v125_v18, %v123_v13  ;;  %v135_v27 = vmul.f32 %v789_v22, %v807_v38  ;;  %v137_v28 = vmul.f32 %v80_v32, %v812_v42 }
  0x25   :  { %v132_v30 = vadd.f32 %v131_v23, %v129_v21  ;;  %v139_v31 = vmul.f32 %v86_v36, %v786_v17  ;;  %v141_v34 = vmul.f32 0.2, %v92_v9  ;;  %v142_v35 = vmul.f32 0.2, %v98_v11 }
  0x26   :  { %v128_v39 = vadd.f32 %v127_v19, %v126_v26  ;;  %v138_v40 = vadd.f32 %v137_v28, %v135_v27  ;;  %v143_v43 = vmul.f32 0.2, %v104_v61  ;;  %v144_v44 = vmul.f32 0.2, %v110_v14 }
  0x27   :  { %v134_v45 = vadd.f32 %v133_v24, %v132_v30  ;;  %v145_v46 = vmul.f32 0.2, %v116_v20  ;;  %v146_v47 = vmul.f32 0.2, %v122_v25  ;;  %v150_v48 = vadd.f32 1.0, %v141_v34 }
  0x28   :  { %v140_v49 = vadd.f32 %v139_v31, %v138_v40  ;;  %v147_v50 = vmul.f32 0.2, %v128_v39  ;;  %v155_v51 = vmul.f32 %v144_v44, %v805_v37  ;;  %v159_v22 = vmul.f32 %v142_v35, %v799_v29 }
  0x29   :  { %v148_v32 = vmul.f32 0.2, %v134_v45  ;;  %v151_v52 = vadd.f32 1.0, %v145_v46  ;;  %v153_v36 = vmul.f32 %v150_v48, %v799_v29  ;;  %v165_v53 = vmul.f32 %v143_v43, %v799_v29 }
  0x2a   :  { %v149_v54 = vmul.f32 0.2, %v140_v49  ;;  %v157_v55 = vmul.f32 %v147_v50, %v778_v10  ;;  %v167_v56 = vmul.f32 %v146_v47, %v805_v37  ;;  %v171_v57 = vmul.f32 %v150_v48, %v810_v41 }
  0x2b   :  { %v156_v58 = vadd.f32 %v155_v51, %v153_v36  ;;  %v161_v59 = vmul.f32 %v151_v52, %v805_v37  ;;  %v163_v60 = vmul.f32 %v148_v32, %v778_v10  ;;  %v173_v61 = vmul.f32 %v144_v44, %v803_v33 }
  0x2c   :  { %v152_v62 = vadd.f32 1.0, %v149_v54  ;;  %v168_v63 = vadd.f32 %v167_v56, %v165_v53  ;;  %v175_v0 = vmul.f32 %v147_v50, %v784_v15  ;;  %v177_v1 = vmul.f32 %v142_v35, %v810_v41 }
  0x2d   :  { %v158_v2 = vadd.f32 %v157_v55, %v156_v58  ;;  %v162_v3 = vadd.f32 %v161_v59, %v159_v22  ;;  %v174_v4 = vadd.f32 %v173_v61, %v171_v57  ;;  %v179_v5 = vmul.f32 %v151_v52, %v803_v33 }
  0x2e   :  { %v169_v6 = vmul.f32 %v152_v62, %v778_v10  ;;  %v181_v7 = vmul.f32 %v148_v32, %v784_v15  ;;  %v183_v8 = vmul.f32 %v143_v43, %v810_v41  ;;  %v185_v9 = vmul.f32 %v146_v47, %v803_v33 }
  0x2f   :  { %v164_v11 = vadd.f32 %v163_v60, %v162_v3  ;;  %v176_v12 = vadd.f32 %v175_v0, %v174_v4  ;;  %v180_v13 = vadd.f32 %v179_v5, %v177_v1  ;;  %v187_v14 = vmul.f32 %v152_v62, %v784_v15 }
  0x30   :  { %v170_v16 = vadd.f32 %v169_v6, %v168_v63  ;;  %v186_v18 = vadd.f32 %v185_v9, %v183_v8  ;;  %v189_v19 = vmul.f32 %v150_v48, %v807_v38  ;;  %v191_v20 = vmul.f32 %v144_v44, %v812_v42 }
  0x31   :  { %v182_v21 = vadd.f32 %v181_v7, %v180_v13  ;;  %v193_v23 = vmul.f32 %v147_v50, %v786_v17  ;;  %v195_v24 = vmul.f32 %v142_v35, %v807_v38  ;;  %v197_v25 = vmul.f32 %v151_v52, %v812_v42 }
  0x32   :  { %v188_v26 = vadd.f32 %v187_v14, %v186_v18  ;;  %v192_v27 = vadd.f32 %v191_v20, %v189_v19  ;;  %v199_v28 = vmul.f32 %v148_v32, %v786_v17  ;;  %v201_v30 = vmul.f32 %v143_v43, %v807_v38 }
  0x33   :  { %v198_v31 = vadd.f32 %v197_v25, %v195_v24  ;;  %v203_v34 = vmul.f32 %v146_v47, %v812_v42  ;;  %v205_v39 = vmul.f32 %v152_v62, %v786_v17  ;;  %v207_v40 = vmul.f32 0.25, %v158_v2 }
  0x34   :  { %v194_v44 = vadd.f32 %v193_v23, %v192_v27  ;;  %v208_v45 = vmul.f32 0.25, %v164_v11  ;;  %v209_v46 = vmul.f32 0.25, %v170_v16  ;;  %v210_v48 = vmul.f32 0.25, %v176_v12 }
  0x35   :  { %v200_v49 = vadd.f32 %v199_v28, %v198_v31  ;;  %v204_v35 = vadd.f32 %v203_v34, %v201_v30  ;;  %v211_v50 = vmul.f32 0.25, %v182_v21  ;;  %v212_v51 = vmul.f32 0.25, %v188_v26 }
  0x36   :  { %v213_v22 = vmul.f32 0.25, %v194_v44  ;;  %v216_v52 = vadd.f32 1.0, %v207_v40  ;;  %v221_v32 = vmul.f32 %v210_v48, %v805_v37  ;;  %v225_v43 = vmul.f32 %v208_v45, %v799_v29 }
  0x37   :  { %v206_v36 = vadd.f32 %v205_v39, %v204_v35  ;;  %v214_v53 = vmul.f32 0.25, %v200_v49  ;;  %v217_v47 = vadd.f32 1.0, %v211_v50  ;;  %v231_v54 = vmul.f32 %v209_v46, %v799_v29 }
  0x38   :  { %v219_v55 = vmul.f32 %v216_v52, %v799_v29  ;;  %v223_v56 = vmul.f32 %v213_v22, %v778_v10  ;;  %v233_v57 = vmul.f32 %v212_v51, %v805_v37  ;;  %v237_v58 = vmul.f32 %v216_v52, %v810_v41 }
  0x39   :  { %v215_v59 = vmul.f32 0.25, %v206_v36  ;;  %v227_v60 = vmul.f32 %v217_v47, %v805_v37  ;;  %v229_v61 = vmul.f32 %v214_v53, %v778_v10  ;;  %v239_v62 = vmul.f32 %v210_v48, %v803_v33 }
  0x3a   :  { %v222_v63 = vadd.f32 %v221_v32, %v219_v55  ;;  %v234_v0 = vadd.f32 %v233_v57, %v231_v54  ;;  %v241_v1 = vmul.f32 %v213_v22, %v784_v15  ;;  %v243_v2 = vmul.f32 %v208_v45, %v810_v41 }
  0x3b   :  { %v218_v3 = vadd.f32 1.0, %v215_v59  ;;  %v228_v4 = vadd.f32 %v227_v60, %v225_v43  ;;  %v240_v5 = vadd.f32 %v239_v62, %v237_v58  ;;  %v245_v6 = vmul.f32 %v217_v47, %v803_v33 }
  0x3c   :  { %v224_v7 = vadd.f32 %v223_v56, %v222_v63  ;;  %v247_v8 = vmul.f32 %v214_v53, %v784_v15  ;;  %v249_v9 = vmul.f32 %v209_v46, %v810_v41  ;;  %v251_v11 = vmul.f32 %v212_v51, %v803_v33 }
  0x3d   :  { %v230_v12 = vadd.f32 %v229_v61, %v228_v4  ;;  %v235_v13 = vmul.f32 %v218_v3, %v778_v10  ;;  %v242_v14 = vadd.f32 %v241_v1, %v240_v5  ;;  %v246_v16 = vadd.f32 %v245_v6, %v243_v2 }
  0x3e   :  { %v252_v18 = vadd.f32 %v251_v11, %v249_v9  ;;  %v253_v19 = vmul.f32 %v218_v3, %v784_v15  ;;  %v255_v20 = vmul.f32 %v216_v52, %v807_v38  ;;  %v257_v21 = vmul.f32 %v210_v48, %v812_v42 }
  0x3f   :  { %v236_v23 = vadd.f32 %v235_v13, %v234_v0  ;;  %v248_v24 = vadd.f32 %v247_v8, %v246_v16  ;;  %v259_v25 = vmul.f32 %v213_v22, %v786_v17  ;;  %v261_v26 = vmul.f32 %v208_v45, %v807_v38 }
  0x40   :  { %v254_v27 = vadd.f32 %v253_v19, %v252_v18  ;;  %v258_v28 = vadd.f32 %v257_v21, %v255_v20  ;;  %v263_v30 = vmul.f32 %v217_v47, %v812_v42  ;;  %v265_v31 = vmul.f32 %v214_v53, %v786_v17 }
  0x41   :  { %v267_v34 = vmul.f32 %v209_v46, %v807_v38  ;;  %v269_v39 = vmul.f32 %v212_v51, %v812_v42  ;;  %v271_v40 = vmul.f32 %v218_v3, %v786_v17  ;;  %v273_v44 = vmul.f32 0.33333334, %v224_v7 }
  0x42   :  { %v260_v48 = vadd.f32 %v259_v25, %v258_v28  ;;  %v264_v49 = vadd.f32 %v263_v30, %v261_v26  ;;  %v274_v35 = vmul.f32 0.33333334, %v230_v12  ;;  %v275_v50 = vmul.f32 0.33333334, %v236_v23 }
  0x43   :  { %v270_v22 = vadd.f32 %v269_v39, %v267_v34  ;;  %v276_v52 = vmul.f32 0.33333334, %v242_v14  ;;  %v277_v45 = vmul.f32 0.33333334, %v248_v24  ;;  %v278_v32 = vmul.f32 0.33333334, %v254_v27 }
  0x44   :  { %v266_v43 = vadd.f32 %v265_v31, %v264_v49  ;;  %v279_v36 = vmul.f32 0.33333334, %v260_v48  ;;  %v282_v47 = vadd.f32 1.0, %v273_v44  ;;  %v291_v53 = vmul.f32 %v274_v35, %v799_v29 }
  0x45   :  { %v272_v54 = vadd.f32 %v271_v40, %v270_v22  ;;  %v283_v46 = vadd.f32 1.0, %v277_v45  ;;  %v287_v51 = vmul.f32 %v276_v52, %v805_v37  ;;  %v297_v55 = vmul.f32 %v275_v50, %v799_v29 }
  0x46   :  { %v280_v56 = vmul.f32 0.33333334, %v266_v43  ;;  %v285_v57 = vmul.f32 %v282_v47, %v799_v29  ;;  %v289_v58 = vmul.f32 %v279_v36, %v778_v10  ;;  %v299_v59 = vmul.f32 %v278_v32, %v805_v37 }
  0x47   :  { %v281_v60 = vmul.f32 0.33333334, %v272_v54  ;;  %v293_v61 = vmul.f32 %v283_v46, %v805_v37  ;;  %v303_v62 = vmul.f32 %v282_v47, %v810_v41  ;;  %v305_v63 = vmul.f32 %v276_v52, %v803_v33 }
  0x48   :  { %v288_v0 = vadd.f32 %v287_v51, %v285_v57  ;;  %v295_v1 = vmul.f32 %v280_v56, %v778_v10  ;;  %v300_v2 = vadd.f32 %v299_v59, %v297_v55  ;;  %v307_v3 = vmul.f32 %v279_v36, %v784_v15 }
  0x49   :  { %v284_v4 = vadd.f32 1.0, %v281_v60  ;;  %v294_v5 = vadd.f32 %v293_v61, %v291_v53  ;;  %v306_v6 = vadd.f32 %v305_v63, %v303_v62  ;;  %v309_v7 = vmul.f32 %v274_v35, %v810_v41 }
  0x4a   :  { %v290_v8 = vadd.f32 %v289_v58, %v288_v0  ;;  %v311_v9 = vmul.f32 %v283_v46, %v803_v33  ;;  %v313_v11 = vmul.f32 %v280_v56, %v784_v15  ;;  %v315_v12 = vmul.f32 %v275_v50, %v810_v41 }
  0x4b   :  { %v296_v13 = vadd.f32 %v295_v1, %v294_v5  ;;  %v301_v14 = vmul.f32 %v284_v4, %v778_v10  ;;  %v308_v16 = vadd.f32 %v307_v3, %v306_v6  ;;  %v317_v18 = vmul.f32 %v278_v32, %v803_v33 }
  0x4c   :  { %v312_v19 = vadd.f32 %v311_v9, %v309_v7  ;;  %v319_v20 = vmul.f32 %v284_v4, %v784_v15  ;;  %v321_v21 = vmul.f32 %v282_v47, %v807_v38  ;;  %v323_v23 = vmul.f32 %v276_v52, %v812_v42 }
  0x4d   :  { %v302_v24 = vadd.f32 %v301_v14, %v300_v2  ;;  %v318_v25 = vadd.f32 %v317_v18, %v315_v12  ;;  %v325_v26 = vmul.f32 %v279_v36, %v786_v17  ;;  %v327_v27 = vmul.f32 %v274_v35, %v807_v38 }
  0x4e   :  { %v314_v28 = vadd.f32 %v313_v11, %v312_v19  ;;  %v324_v30 = vadd.f32 %v323_v23, %v321_v21  ;;  %v329_v31 = vmul.f32 %v283_v46, %v812_v42  ;;  %v331_v34 = vmul.f32 %v280_v56, %v786_v17 }
  0x4f   :  { %v320_v39 = vadd.f32 %v319_v20, %v318_v25  ;;  %v333_v40 = vmul.f32 %v275_v50, %v807_v38  ;;  %v335_v44 = vmul.f32 %v278_v32, %v812_v42  ;;  %v337_v48 = vmul.f32 %v284_v4, %v786_v17 }
  0x50   :  { %v326_v49 = vadd.f32 %v325_v26, %v324_v30  ;;  %v330_v22 = vadd.f32 %v329_v31, %v327_v27  ;;  %v339_v52 = vmul.f32 0.5, %v290_v8  ;;  %v340_v45 = vmul.f32 0.5, %v296_v13 }
  0x51   :  { %v336_v43 = vadd.f32 %v335_v44, %v333_v40  ;;  %v341_v36 = vmul.f32 0.5, %v302_v24  ;;  %v342_v35 = vmul.f32 0.5, %v308_v16  ;;  %v343_v47 = vmul.f32 0.5, %v314_v28 }
  0x52   :  { %v332_v53 = vadd.f32 %v331_v34, %v330_v22  ;;  %v344_v54 = vmul.f32 0.5, %v320_v39  ;;  %v345_v46 = vmul.f32 0.5, %v326_v49  ;;  %v348_v51 = vadd.f32 1.0, %v339_v52 }
  0x53   :  { %v338_v55 = vadd.f32 %v337_v48, %v336_v43  ;;  %v349_v56 = vadd.f32 1.0, %v343_v47  ;;  %v353_v50 = vmul.f32 %v342_v35, %v805_v37  ;;  %v357_v32 = vmul.f32 %v340_v45, %v799_v29 }
  0x54   :  { %v346_v57 = vmul.f32 0.5, %v332_v53  ;;  %v351_v58 = vmul.f32 %v348_v51, %v799_v29  ;;  %v355_v59 = vmul.f32 %v345_v46, %v778_v10  ;;  %v363_v60 = vmul.f32 %v341_v36, %v799_v29 }
  0x55   :  { %v347_v61 = vmul.f32 0.5, %v338_v55  ;;  %v359_v62 = vmul.f32 %v349_v56, %v805_v37  ;;  %v365_v63 = vmul.f32 %v344_v54, %v805_v37  ;;  %v369_v0 = vmul.f32 %v348_v51, %v810_v41 }
  0x56   :  { %v354_v1 = vadd.f32 %v353_v50, %v351_v58  ;;  %v361_v2 = vmul.f32 %v346_v57, %v778_v10  ;;  %v371_v3 = vmul.f32 %v342_v35, %v803_v33  ;;  %v373_v4 = vmul.f32 %v345_v46, %v784_v15 }
  0x57   :  { %v350_v5 = vadd.f32 1.0, %v347_v61  ;;  %v360_v6 = vadd.f32 %v359_v62, %v357_v32  ;;  %v366_v7 = vadd.f32 %v365_v63, %v363_v60  ;;  %v375_v8 = vmul.f32 %v340_v45, %v810_v41 }
  0x58   :  { %v356_v29 = vadd.f32 %v355_v59, %v354_v1  ;;  %v372_v9 = vadd.f32 %v371_v3, %v369_v0  ;;  %v377_v11 = vmul.f32 %v349_v56, %v803_v33  ;;  %v379_v37 = vmul.f32 %v346_v57, %v784_v15 }
  0x59   :  { %v362_v12 = vadd.f32 %v361_v2, %v360_v6  ;;  %v367_v13 = vmul.f32 %v350_v5, %v778_v10  ;;  %v381_v14 = vmul.f32 %v341_v36, %v810_v41  ;;  %v383_v16 = vmul.f32 %v344_v54, %v803_v33 }
  0x5a   :  { %v374_v18 = vadd.f32 %v373_v4, %v372_v9  ;;  %v378_v19 = vadd.f32 %v377_v11, %v375_v8  ;;  %v385_v20 = vmul.f32 %v350_v5, %v784_v15  ;;  %v387_v21 = vmul.f32 %v348_v51, %v807_v38 }
  0x5b   :  { %v368_v23 = vadd.f32 %v367_v13, %v366_v7  ;;  %v384_v24 = vadd.f32 %v383_v16, %v381_v14  ;;  %v389_v25 = vmul.f32 %v342_v35, %v812_v42  ;;  %v391_v26 = vmul.f32 %v345_v46, %v786_v17 }
  0x5c   :  { %v380_v27 = vadd.f32 %v379_v37, %v378_v19  ;;  %v393_v28 = vmul.f32 %v340_v45, %v807_v38  ;;  %v395_v10 = vmul.f32 %v349_v56, %v812_v42  ;;  %v397_v41 = vmul.f32 %v346_v57, %v786_v17 }
  0x5d   :  { %v386_v33 = vadd.f32 %v385_v20, %v384_v24  ;;  %v390_v30 = vadd.f32 %v389_v25, %v387_v21  ;;  %v399_v31 = vmul.f32 %v341_v36, %v807_v38  ;;  %v401_v15 = vmul.f32 %v344_v54, %v812_v42 }
  0x5e   :  { %v396_v34 = vadd.f32 %v395_v10, %v393_v28  ;;  %v403_v39 = vmul.f32 %v350_v5, %v786_v17  ;;  %v405_v40 = vadd.f32 1.0, %v356_v29  ;;  %v406_v44 = vadd.f32 1.0, %v380_v27 }
  0x5f   :  { %v392_v48 = vadd.f32 %v391_v26, %v390_v30  ;;  %v402_v49 = vadd.f32 %v401_v15, %v399_v31  ;;  %v410_v22 = vmul.f32 %v374_v18, %v362_v12  ;;  %v422_v52 = vmul.f32 %v386_v33, %v362_v12 }
  0x60   :  { %v398_v45 = vadd.f32 %v397_v41, %v396_v34  ;;  %v408_v43 = vmul.f32 %v405_v40, %v405_v40  ;;  %v414_v35 = vmul.f32 %v405_v40, %v362_v12  ;;  %v416_v47 = vmul.f32 %v406_v44, %v362_v12 }
  0x61   :  { %v404_v53 = vadd.f32 %v403_v39, %v402_v49  ;;  %v412_v46 = vmul.f32 %v392_v48, %v368_v23  ;;  %v420_v51 = vmul.f32 %v405_v40, %v368_v23  ;;  %v426_v55 = vmul.f32 %v405_v40, %v374_v18 }
  0x62   :  { %v411_v38 = vadd.f32 %v410_v22, %v408_v43  ;;  %v417_v36 = vadd.f32 %v416_v47, %v414_v35  ;;  %v418_v42 = vmul.f32 %v398_v45, %v368_v23  ;;  %v428_v54 = vmul.f32 %v406_v44, %v374_v18 }
  0x63   :  { %v407_v56 = vadd.f32 1.0, %v404_v53  ;;  %v423_v17 = vadd.f32 %v422_v52, %v420_v51  ;;  %v430_v50 = vmul.f32 %v392_v48, %v386_v33  ;;  %v433_v32 = vmul.f32 %v406_v44, %v406_v44 }
  0x64   :  { %v413_v57 = vadd.f32 %v412_v46, %v411_v38  ;;  %v419_v58 = vadd.f32 %v418_v42, %v417_v36  ;;  %v429_v59 = vadd.f32 %v428_v54, %v426_v55  ;;  %v435_v60 = vmul.f32 %v398_v45, %v386_v33 }
  0x65   :  { %v424_v61 = vmul.f32 %v407_v56, %v368_v23  ;;  %v434_v62 = vadd.f32 %v433_v32, %v410_v22  ;;  %v437_v63 = vmul.f32 %v374_v18, %v368_v23  ;;  %v439_v0 = vmul.f32 %v406_v44, %v386_v33 }
  0x66   :  { %v431_v1 = vadd.f32 %v430_v50, %v429_v59  ;;  %v441_v2 = vmul.f32 %v407_v56, %v386_v33  ;;  %v443_v3 = vmul.f32 %v405_v40, %v392_v48  ;;  %v445_v4 = vmul.f32 %v398_v45, %v374_v18 }
  0x67   :  { %v425_v5 = vadd.f32 %v424_v61, %v423_v17  ;;  %v436_v6 = vadd.f32 %v435_v60, %v434_v62  ;;  %v440_v7 = vadd.f32 %v439_v0, %v437_v63  ;;  %v447_v8 = vmul.f32 %v407_v56, %v392_v48 }
  0x68   :  { %v446_v29 = vadd.f32 %v445_v4, %v443_v3  ;;  %v449_v9 = vmul.f32 %v392_v48, %v362_v12  ;;  %v451_v11 = vmul.f32 %v406_v44, %v398_v45  ;;  %v453_v37 = vmul.f32 %v407_v56, %v398_v45 }
  0x69   :  { %v442_v13 = vadd.f32 %v441_v2, %v440_v7  ;;  %v456_v14 = vadd.f32 %v435_v60, %v412_v46  ;;  %v457_v16 = vmul.f32 %v407_v56, %v407_v56  ;;  %v459_v19 = vmul.f32 %v413_v57, %v413_v57 }
  0x6a   :  { %v448_v20 = vadd.f32 %v447_v8, %v446_v29  ;;  %v452_v21 = vadd.f32 %v451_v11, %v449_v9  ;;  %v461_v23 = vmul.f32 %v431_v1, %v419_v58  ;;  %v465_v24 = vmul.f32 %v419_v58, %v413_v57 }
  0x6b   :  { %v458_v25 = vadd.f32 %v457_v16, %v456_v14  ;;  %v467_v26 = vmul.f32 %v436_v6, %v419_v58  ;;  %v471_v27 = vmul.f32 %v425_v5, %v413_v57  ;;  %v473_v18 = vmul.f32 %v442_v13, %v419_v58 }
  0x6c   :  { %v454_v28 = vadd.f32 %v453_v37, %v452_v21  ;;  %v462_v10 = vadd.f32 %v461_v23, %v459_v19  ;;  %v463_v41 = vmul.f32 %v448_v20, %v425_v5  ;;  %v477_v33 = vmul.f32 %v431_v1, %v413_v57 }
  0x6d   :  { %v468_v30 = vadd.f32 %v467_v26, %v465_v24  ;;  %v474_v12 = vadd.f32 %v473_v18, %v471_v27  ;;  %v475_v31 = vmul.f32 %v458_v25, %v425_v5  ;;  %v479_v15 = vmul.f32 %v436_v6, %v431_v1 }
  0x6e   :  { %v464_v34 = vadd.f32 %v463_v41, %v462_v10  ;;  %v469_v39 = vmul.f32 %v454_v28, %v425_v5  ;;  %v481_v40 = vmul.f32 %v448_v20, %v442_v13  ;;  %v484_v44 = vmul.f32 %v436_v6, %v436_v6 }
  0x6f   :  { %v476_v48 = vadd.f32 %v475_v31, %v474_v12  ;;  %v480_v49 = vadd.f32 %v479_v15, %v477_v33  ;;  %v486_v22 = vmul.f32 %v454_v28, %v442_v13  ;;  %v488_v52 = vmul.f32 %v431_v1, %v425_v5 }
  0x70   :  { %v470_v45 = vadd.f32 %v469_v39, %v468_v30  ;;  %v485_v43 = vadd.f32 %v484_v44, %v461_v23  ;;  %v490_v35 = vmul.f32 %v442_v13, %v436_v6  ;;  %v492_v47 = vmul.f32 %v458_v25, %v442_v13 }
  0x71   :  { %v482_v53 = vadd.f32 %v481_v40, %v480_v49  ;;  %v494_v46 = vmul.f32 %v448_v20, %v413_v57  ;;  %v496_v51 = vmul.f32 %v454_v28, %v431_v1  ;;  %v498_v55 = vmul.f32 %v458_v25, %v448_v20 }
  0x72   :  { %v487_v38 = vadd.f32 %v486_v22, %v485_v43  ;;  %v491_v36 = vadd.f32 %v490_v35, %v488_v52  ;;  %v500_v42 = vmul.f32 %v448_v20, %v419_v58  ;;  %v502_v54 = vmul.f32 %v454_v28, %v436_v6 }
  0x73   :  { %v497_v56 = vadd.f32 %v496_v51, %v494_v46  ;;  %v504_v17 = vmul.f32 %v458_v25, %v454_v28  ;;  %v507_v50 = vadd.f32 %v486_v22, %v463_v41  ;;  %v508_v32 = vmul.f32 %v458_v25, %v458_v25 }
  0x74   :  { %v493_v59 = vadd.f32 %v492_v47, %v491_v36  ;;  %v503_v60 = vadd.f32 %v502_v54, %v500_v42  ;;  %v510_v61 = vmul.f32 %v464_v34, %v464_v34  ;;  %v512_v62 = vmul.f32 %v482_v53, %v470_v45 }
  0x75   :  { %v499_v63 = vadd.f32 %v498_v55, %v497_v56  ;;  %v509_v0 = vadd.f32 %v508_v32, %v507_v50  ;;  %v516_v2 = vmul.f32 %v470_v45, %v464_v34  ;;  %v518_v3 = vmul.f32 %v487_v38, %v470_v45 }
  0x76   :  { %v505_v4 = vadd.f32 %v504_v17, %v503_v60  ;;  %v513_v57 = vadd.f32 %v512_v62, %v510_v61  ;;  %v522_v1 = vmul.f32 %v476_v48, %v464_v34  ;;  %v524_v5 = vmul.f32 %v493_v59, %v470_v45 }
  0x77   :  { %v514_v7 = vmul.f32 %v499_v63, %v476_v48  ;;  %v519_v8 = vadd.f32 %v518_v3, %v516_v2  ;;  %v528_v58 = vmul.f32 %v482_v53, %v464_v34  ;;  %v526_v9 = vmul.f32 %v509_v0, %v476_v48 }
  0x78   :  { %v520_v6 = vmul.f32 %v505_v4, %v476_v48  ;;  %v525_v29 = vadd.f32 %v524_v5, %v522_v1  ;;  %v530_v11 = vmul.f32 %v487_v38, %v482_v53  ;;  %v532_v37 = vmul.f32 %v499_v63, %v493_v59 }
  0x79   :  { %v535_v13 = vmul.f32 %v487_v38, %v487_v38  ;;  %v539_v14 = vmul.f32 %v482_v53, %v476_v48  ;;  %v515_v16 = vadd.f32 %v514_v7, %v513_v57  ;;  %v537_v20 = vmul.f32 %v505_v4, %v493_v59 }
  0x7a   :  { %v521_v19 = vadd.f32 %v520_v6, %v519_v8  ;;  %v541_v21 = vmul.f32 %v493_v59, %v487_v38  ;;  %v531_v23 = vadd.f32 %v530_v11, %v528_v58  ;;  %v543_v24 = vmul.f32 %v509_v0, %v493_v59 }
  0x7b   :  { %v545_v25 = vmul.f32 %v499_v63, %v464_v34  ;;  %v547_v26 = vmul.f32 %v505_v4, %v482_v53  ;;  %v527_v27 = vadd.f32 %v526_v9, %v525_v29  ;;  %v536_v18 = vadd.f32 %v535_v13, %v512_v62 }
  0x7c   :  { %v542_v28 = vadd.f32 %v541_v21, %v539_v14  ;;  %v551_v10 = vmul.f32 %v499_v63, %v470_v45  ;;  %v549_v33 = vmul.f32 %v509_v0, %v499_v63  ;;  %v553_v30 = vmul.f32 %v505_v4, %v487_v38 }
  0x7d   :  { %v548_v41 = vadd.f32 %v547_v26, %v545_v25  ;;  %v555_v12 = vmul.f32 %v509_v0, %v505_v4  ;;  %v558_v15 = vadd.f32 %v537_v20, %v514_v7  ;;  %v559_v39 = vmul.f32 %v509_v0, %v509_v0 }
  0x7e   :  { %v544_v31 = vadd.f32 %v543_v24, %v542_v28  ;;  %v533_v40 = vadd.f32 %v532_v37, %v531_v23  ;;  %v554_v44 = vadd.f32 %v553_v30, %v551_v10  ;;  %v538_v48 = vadd.f32 %v537_v20, %v536_v18 }
  0x7f   :  { %v560_v49 = vadd.f32 %v559_v39, %v558_v15  ;;  %v573_v22 = vmul.f32 %v527_v27, %v515_v16  ;;  %v550_v43 = vadd.f32 %v549_v33, %v548_v41  ;;  %v561_v35 = vmul.f32 %v515_v16, %v515_v16 }
  0x80   :  { %v575_v52 = vmul.f32 %v544_v31, %v521_v19  ;;  %v556_v34 = vadd.f32 %v555_v12, %v554_v44  ;;  %v563_v46 = vmul.f32 %v533_v40, %v521_v19  ;;  %v567_v51 = vmul.f32 %v521_v19, %v515_v16 }
  0x81   :  { %v577_v53 = vmul.f32 %v560_v49, %v527_v27  ;;  %v565_v45 = vmul.f32 %v550_v43, %v527_v27  ;;  %v569_v38 = vmul.f32 %v538_v48, %v521_v19  ;;  %v579_v36 = vmul.f32 %v533_v40, %v515_v16 }
  0x82   :  { %v576_v47 = vadd.f32 %v575_v52, %v573_v22  ;;  %v588_v55 = vmul.f32 %v556_v34, %v544_v31  ;;  %v590_v42 = vmul.f32 %v533_v40, %v527_v27  ;;  %v592_v54 = vmul.f32 %v544_v31, %v538_v48 }
  0x83   :  { %v581_v56 = vmul.f32 %v538_v48, %v533_v40  ;;  %v594_v17 = vmul.f32 %v560_v49, %v544_v31  ;;  %v596_v50 = vmul.f32 %v550_v43, %v515_v16  ;;  %v598_v32 = vmul.f32 %v556_v34, %v533_v40 }
  0x84   :  { %v578_v59 = vadd.f32 %v577_v53, %v576_v47  ;;  %v593_v60 = vadd.f32 %v592_v54, %v590_v42  ;;  %v600_v61 = vmul.f32 %v560_v49, %v550_v43  ;;  %v602_v62 = vmul.f32 %v550_v43, %v521_v19 }
  0x85   :  { %v599_v63 = vadd.f32 %v598_v32, %v596_v50  ;;  %v604_v0 = vmul.f32 %v556_v34, %v538_v48  ;;  %v606_v2 = vmul.f32 %v560_v49, %v556_v34  ;;  %v609_v3 = vadd.f32 %v588_v55, %v565_v45 }
  0x86   :  { %v564_v4 = vadd.f32 %v563_v46, %v561_v35  ;;  %v570_v57 = vadd.f32 %v569_v38, %v567_v51  ;;  %v610_v1 = vmul.f32 %v560_v49, %v560_v49  ;;  %v595_v5 = vadd.f32 %v594_v17, %v593_v60 }
  0x87   :  { %v601_v7 = vadd.f32 %v600_v61, %v599_v63  ;;  %v605_v8 = vadd.f32 %v604_v0, %v602_v62  ;;  %v586_v58 = vmul.f32 %v538_v48, %v538_v48  ;;  %v571_v6 = vmul.f32 %v556_v34, %v527_v27 }
  0x88   :  { %v582_v29 = vadd.f32 %v581_v56, %v579_v36  ;;  %v583_v9 = vmul.f32 %v550_v43, %v544_v31  ;;  %v611_v11 = vadd.f32 %v610_v1, %v609_v3  ;;  %v566_v20 = vadd.f32 %v565_v45, %v564_v4 }
  0x89   :  { %v607_v37 = vadd.f32 %v606_v2, %v605_v8  ;;  %v616_v13 = vmul.f32 %v601_v7, %v578_v59  ;;  %v587_v14 = vadd.f32 %v586_v58, %v563_v46  ;;  %v572_v21 = vadd.f32 %v571_v6, %v570_v57 }
  0x8a   :  { %v661_v19 = vmul.f32 %v611_v11, %v611_v11  ;;  %v584_v23 = vadd.f32 %v583_v9, %v582_v29  ;;  %v612_v18 = vmul.f32 %v566_v20, %v566_v20  ;;  %v624_v10 = vmul.f32 %v578_v59, %v566_v20 }
  0x8b   :  { %v639_v16 = vmul.f32 %v607_v37, %v595_v5  ;;  %v589_v25 = vadd.f32 %v588_v55, %v587_v14  ;;  %v626_v41 = vmul.f32 %v595_v5, %v572_v21  ;;  %v618_v27 = vmul.f32 %v572_v21, %v566_v20 }
  0x8c   :  { %v614_v28 = vmul.f32 %v584_v23, %v572_v21  ;;  %v630_v30 = vmul.f32 %v584_v23, %v566_v20  ;;  %v628_v40 = vmul.f32 %v611_v11, %v578_v59  ;;  %v641_v44 = vmul.f32 %v584_v23, %v578_v59 }
  0x8d   :  { %v660_v24 = vadd.f32 %v639_v16, %v616_v13  ;;  %v620_v33 = vmul.f32 %v589_v25, %v572_v21  ;;  %v632_v12 = vmul.f32 %v589_v25, %v584_v23  ;;  %v637_v15 = vmul.f32 %v589_v25, %v589_v25 }
  0x8e   :  { %v615_v31 = vadd.f32 %v614_v28, %v612_v18  ;;  %v627_v39 = vadd.f32 %v626_v41, %v624_v10  ;;  %v643_v48 = vmul.f32 %v595_v5, %v589_v25  ;;  %v622_v22 = vmul.f32 %v607_v37, %v578_v59 }
  0x8f   :  { %v662_v26 = vadd.f32 %v661_v19, %v660_v24  ;;  %v621_v49 = vadd.f32 %v620_v33, %v618_v27  ;;  %v647_v52 = vmul.f32 %v601_v7, %v566_v20  ;;  %v649_v43 = vmul.f32 %v607_v37, %v584_v23 }
  0x90   :  { %v633_v35 = vadd.f32 %v632_v12, %v630_v30  ;;  %v634_v47 = vmul.f32 %v601_v7, %v595_v5  ;;  %v653_v53 = vmul.f32 %v601_v7, %v572_v21  ;;  %v655_v46 = vmul.f32 %v607_v37, %v589_v25 }
  0x91   :  { %719 = vrcp.f32 %v662_v26  ;;  %v638_v51 = vadd.f32 %v637_v15, %v614_v28  ;;  %v617_v55 = vadd.f32 %v616_v13, %v615_v31  ;;  %v629_v38 = vadd.f32 %v628_v40, %v627_v39 }
  0x92   :  { %v644_v36 = vadd.f32 %v643_v48, %v641_v44  ;;  %v645_v42 = vmul.f32 %v611_v11, %v595_v5  ;;  %v623_v56 = vadd.f32 %v622_v22, %v621_v49  ;;  %v650_v17 = vadd.f32 %v649_v43, %v647_v52 }
  0x93   :  { %v651_v50 = vmul.f32 %v611_v11, %v601_v7  ;;  %v635_v32 = vadd.f32 %v634_v47, %v633_v35  ;;  %v656_v60 = vadd.f32 %v655_v46, %v653_v53  ;;  %v657_v59 = vmul.f32 %v611_v11, %v607_v37 }
  0x94   :  { %v640_v62 = vadd.f32 %v639_v16, %v638_v51  ;;  %v646_v63 = vadd.f32 %v645_v42, %v644_v36 }
  0x95   :  { %v652_v4 = vadd.f32 %v651_v50, %v650_v17  ;;  %v658_v1 = vadd.f32 %v657_v59, %v656_v60 }
  0x97   :  { %v720_v34 = vpop.eup %719 }
  0x98   :  { %v664_v45 = vmul.f32 %v720_v34, %v662_v26 }
  0x9a   :  { %v665_v54 = vsub.f32 2.0, %v664_v45 }
  0x9c   :  { %v666_v61 = vmul.f32 %v720_v34, %v665_v54 }
  0x9e   :  { %v667_v0 = vmul.f32 %v666_v61, %v617_v55  ;;  %v669_v2 = vmul.f32 %v666_v61, %v623_v56  ;;  %v672_v3 = vmul.f32 %v666_v61, %v629_v38  ;;  %v675_v57 = vmul.f32 %v666_v61, %v635_v32 }
  0x9f   :  { %v678_v5 = vmul.f32 %v666_v61, %v640_v62  ;;  %v681_v7 = vmul.f32 %v666_v61, %v646_v63  ;;  %v684_v8 = vmul.f32 %v666_v61, %v652_v4  ;;  %v687_v58 = vmul.f32 %v666_v61, %v658_v1 }
  0xa0   :  { %668 = vst [vmem:[%s986_s2] sm:$0xff] %v667_v0  ;;  %v690_v6 = vmul.f32 %v666_v61, %v662_v26 }
  0xa1   :  { %710 = vst [vmem:[%s986_s2 + $0x8] sm:$0xff] %v669_v2 }
  0xa2   :  { %711 = vst [vmem:[%s986_s2 + $0x10] sm:$0xff] %v672_v3 }
  0xa3   :  { %712 = vst [vmem:[%s986_s2 + $0x18] sm:$0xff] %v675_v57 }
  0xa4   :  { %713 = vst [vmem:[%s986_s2 + $0x20] sm:$0xff] %v678_v5 }
  0xa5   :  { %714 = vst [vmem:[%s986_s2 + $0x28] sm:$0xff] %v681_v7 }
  0xa6   :  { %715 = vst [vmem:[%s986_s2 + $0x30] sm:$0xff] %v684_v8 }
  0xa7   :  { %716 = vst [vmem:[%s986_s2 + $0x38] sm:$0xff] %v687_v58 }
  0xa8   :  { %717 = vst [vmem:[%s986_s2 + $0x40] sm:$0xff] %v690_v6 }
  0xa9   :  { %697 = vsyncpa [#allocation3], 1 }

</bundles_post_ra>
